<compile_context>
chip_gen: v7x
topology: tpu7x:2x2x1
jax: 0.10.0
libtpu: 0.0.40
codegen_flags: <defaults>
</compile_context>

<pallas_src>
import functools

import jax
import jax.numpy as jnp
from jax.experimental import pallas as pl
from jax.experimental.pallas import tpu as pltpu

# bf16 MXU operands (set to jnp.float32 for bit-exact f32 matmul semantics).
MATMUL_DTYPE = jnp.bfloat16

NUM_GROUPS = 2  # GRNN chunks the input / hidden into two independent GRUs.


def _pick_chunk(T, N):
    """Timesteps per output-store chunk so that chunk_t * N rows cover whole
    8-row sublane tiles (aligned loads/stores).  Falls back to 1."""
    for ct in range(1, min(T, 16) + 1):
        if (ct * N) % 8 == 0 and T % ct == 0:
            return ct
    return 1


# ----------------------------------------------------------------------------
# Pallas kernel: whole module (both groups, full sequence) in one invocation.
# ----------------------------------------------------------------------------
def _grnn_kernel(x_ref, wih_ref, whh_ref, bih_ref, bhh_ref, h0_ref,
                 y_ref, hn_ref, gir_sc, giz_sc, gin_sc, *, chunk_t):
    """Refs (I = input_size, HH = hidden_size; weights block-diag over groups):

    x_ref   : (T*N, I)    time-major rows (row = t*N + n), MATMUL_DTYPE
    wih_ref : (3, I, HH)  per-gate input weights (reset|update|new), bf16
    whh_ref : (3, HH, HH) per-gate hidden weights, bf16
    bih_ref : (3, 1, HH)  f32
    bhh_ref : (3, 1, HH)  f32
    h0_ref  : (N, HH)     f32 initial hidden state
    y_ref   : (T*N, HH)   f32 all hidden states (time-major rows, output)
    hn_ref  : (N, HH)     f32 final hidden state (output)
    gi*_sc  : (T*N, HH)   f32 VMEM scratch, hoisted input projection per gate
    """
    TN, HH = y_ref.shape
    N = hn_ref.shape[0]
    T = TN // N
    rows = chunk_t * N            # rows stored per chunk (multiple of 8 here)
    n_chunks = T // chunk_t

    # --- Hoisted input projection: one batched MXU matmul per gate, covering
    #     both groups via the block-diagonal weight packing.  Fold b_hr / b_hz
    #     here so the recurrent path only adds b_hn. ---
    x2d = x_ref[...]                                       # (T*N, I) bf16
    gir_sc[...] = (jnp.dot(x2d, wih_ref[0], preferred_element_type=jnp.float32)
                   + bih_ref[0] + bhh_ref[0])
    giz_sc[...] = (jnp.dot(x2d, wih_ref[1], preferred_element_type=jnp.float32)
                   + bih_ref[1] + bhh_ref[1])
    gin_sc[...] = (jnp.dot(x2d, wih_ref[2], preferred_element_type=jnp.float32)
                   + bih_ref[2])

    # Hidden weights / new-gate hidden bias: loaded / broadcast ONCE, reused
    # every step (same three gate-major RHS tiles across the whole sequence).
    w_r = whh_ref[0]
    w_z = whh_ref[1]
    w_n = whh_ref[2]
    b_n = jnp.broadcast_to(bhh_ref[2], (N, HH))            # hoisted broadcast

    def chunk_step(c, h):
        row0 = pl.multiple_of(c * rows, rows)
        # Aligned chunk loads of the staged projection; per-step gate slices
        # below are static (free) instead of misaligned dynamic sublane slices.
        gi_r_c = gir_sc[pl.ds(row0, rows), :]
        gi_z_c = giz_sc[pl.ds(row0, rows), :]
        gi_n_c = gin_sc[pl.ds(row0, rows), :]

        outs = []
        for j in range(chunk_t):                           # static inner unroll
            hb = h.astype(MATMUL_DTYPE)                    # bf16 MXU LHS
            gh_r = jnp.dot(hb, w_r, preferred_element_type=jnp.float32)
            gh_z = jnp.dot(hb, w_z, preferred_element_type=jnp.float32)
            gh_n = jnp.dot(hb, w_n, preferred_element_type=jnp.float32) + b_n

            sl = slice(j * N, (j + 1) * N)                 # static sub-slice
            r = jax.nn.sigmoid(gi_r_c[sl] + gh_r)
            z = jax.nn.sigmoid(gi_z_c[sl] + gh_z)
            n = jnp.tanh(gi_n_c[sl] + r * gh_n)
            h = (1.0 - z) * n + z * h                      # f32 recurrence
            outs.append(h)

        # One aligned, batched store per chunk instead of chunk_t masked
        # (N, HH) stores.
        tile = jnp.concatenate(outs, axis=0) if chunk_t > 1 else outs[0]
        y_ref[pl.ds(row0, rows), :] = tile
        return h

    unroll = True if n_chunks <= 16 else 8                 # cap live ranges
    h_last = jax.lax.fori_loop(0, n_chunks, chunk_step, h0_ref[...],
                               unroll=unroll)
    hn_ref[...] = h_last


# ----------------------------------------------------------------------------
# Wrapper (JAX glue: one time-major restaging pass + one pallas_call)
# ----------------------------------------------------------------------------
def grnn_forward(x, params, h0=None):
    """x: (N, T, input_size) f32.  Returns (y, h_n) like the PyTorch module:
       y: (N, T, hidden_size), h_n: (num_layers=1, N, hidden_size)."""
    N, T, I = x.shape
    HH = params["whh"].shape[-1]                           # hidden_size

    if h0 is None:                                         # module default
        h0 = jnp.zeros((1, N, HH), jnp.float32)

    # Single restaging pass: (N, T, I) -> time-major rows, bf16 cast fused in.
    # The group split is implicit in the block-diagonal weights; no per-group
    # stack / reshape / concat HBM round trips.
    x_tm = x.transpose(1, 0, 2).astype(MATMUL_DTYPE).reshape(T * N, I)
    h0_in = h0[0].astype(jnp.float32)

    chunk_t = _pick_chunk(T, N)
    kernel = functools.partial(_grnn_kernel, chunk_t=chunk_t)

    y_flat, hn = pl.pallas_call(
        kernel,
        out_shape=(jax.ShapeDtypeStruct((T * N, HH), jnp.float32),
                   jax.ShapeDtypeStruct((N, HH), jnp.float32)),
        grid=(1,),
        in_specs=[
            pl.BlockSpec((T * N, I), lambda i: (0, 0)),
            pl.BlockSpec((3, I, HH), lambda i: (0, 0, 0)),
            pl.BlockSpec((3, HH, HH), lambda i: (0, 0, 0)),
            pl.BlockSpec((3, 1, HH), lambda i: (0, 0, 0)),
            pl.BlockSpec((3, 1, HH), lambda i: (0, 0, 0)),
            pl.BlockSpec((N, HH), lambda i: (0, 0)),
        ],
        out_specs=(
            pl.BlockSpec((T * N, HH), lambda i: (0, 0)),
            pl.BlockSpec((N, HH), lambda i: (0, 0)),
        ),
        scratch_shapes=[pltpu.VMEM((T * N, HH), jnp.float32) for _ in range(3)],
        compiler_params=pltpu.CompilerParams(
            dimension_semantics=("arbitrary",),
            vmem_limit_bytes=32 * 1024 * 1024),
    )(x_tm, params["wih"], params["whh"], params["bih"], params["bhh"], h0_in)

    # Back to batch_first; hn already IS torch.cat([h1, h2], dim=-1).
    y = y_flat.reshape(T, N, HH).transpose(1, 0, 2)
    return y, hn[None]


# ----------------------------------------------------------------------------
# Deterministic synthetic parameters
# (PyTorch nn.GRU layout -> gate-major, block-diagonal-over-groups packing)
# ----------------------------------------------------------------------------
def make_grnn_params(key, input_size, hidden_size):
    """PyTorch stores weight_ih_l0 as (3H, C) with gate rows (reset|update|new).
    Repack per gate as (input_size, hidden_size) / (hidden_size, hidden_size)
    with the two groups placed block-diagonally, so a single matmul per gate
    computes both independent GRUs and the group concat is implicit."""
    G = NUM_GROUPS
    C = input_size // G
    H = hidden_size // G
    bound = 1.0 / (H ** 0.5)
    ks = jax.random.split(key, 4 * G)

    def u(k, shape):
        return jax.random.uniform(k, shape, jnp.float32, -bound, bound)

    wih = jnp.zeros((3, input_size, hidden_size), jnp.float32)
    whh = jnp.zeros((3, hidden_size, hidden_size), jnp.float32)
    bih = jnp.zeros((3, 1, hidden_size), jnp.float32)
    bhh = jnp.zeros((3, 1, hidden_size), jnp.float32)
    for g in range(G):
        k0, k1, k2, k3 = ks[4 * g:4 * g + 4]
        w_ih = u(k0, (3 * H, C))                       # PyTorch layout
        w_hh = u(k1, (3 * H, H))
        b_ih = u(k2, (3 * H,))
        b_hh = u(k3, (3 * H,))
        wih = wih.at[:, g * C:(g + 1) * C, g * H:(g + 1) * H].set(
            w_ih.reshape(3, H, C).transpose(0, 2, 1))
        whh = whh.at[:, g * H:(g + 1) * H, g * H:(g + 1) * H].set(
            w_hh.reshape(3, H, H).transpose(0, 2, 1))
        bih = bih.at[:, 0, g * H:(g + 1) * H].set(b_ih.reshape(3, H))
        bhh = bhh.at[:, 0, g * H:(g + 1) * H].set(b_hh.reshape(3, H))
    return {
        "wih": wih.astype(MATMUL_DTYPE),
        "whh": whh.astype(MATMUL_DTYPE),
        "bih": bih,
        "bhh": bhh,
    }


# ----------------------------------------------------------------------------
# Pure-JAX reference: runs the two GRUs separately on the group blocks sliced
# back out of the packed weights (matches the kernel's operand rounding).
# ----------------------------------------------------------------------------
def grnn_reference(x, params, h0=None):
    N, T, I = x.shape
    HH = params["whh"].shape[-1]
    G = NUM_GROUPS
    C = I // G
    H = HH // G
    wih = params["wih"].astype(jnp.float32)
    whh = params["whh"].astype(jnp.float32)
    bih = params["bih"].astype(jnp.float32)
    bhh = params["bhh"].astype(jnp.float32)
    xr = x.astype(MATMUL_DTYPE).astype(jnp.float32)    # same operand rounding
    if h0 is None:
        h0 = jnp.zeros((1, N, HH), jnp.float32)
    ys, hs = [], []
    for g in range(G):
        wih_g = [wih[k, g * C:(g + 1) * C, g * H:(g + 1) * H] for k in range(3)]
        whh_g = [whh[k, g * H:(g + 1) * H, g * H:(g + 1) * H] for k in range(3)]
        bih_g = [bih[k, 0, g * H:(g + 1) * H] for k in range(3)]
        bhh_g = [bhh[k, 0, g * H:(g + 1) * H] for k in range(3)]
        xg = xr[..., g * C:(g + 1) * C]
        h_init = h0[0, :, g * H:(g + 1) * H]

        def cell(h, x_t, wih_g=wih_g, whh_g=whh_g, bih_g=bih_g, bhh_g=bhh_g):
            hb = h.astype(MATMUL_DTYPE).astype(jnp.float32)
            gi = [x_t @ wih_g[k] + bih_g[k] for k in range(3)]
            gh = [hb @ whh_g[k] + bhh_g[k] for k in range(3)]
            r = jax.nn.sigmoid(gi[0] + gh[0])
            z = jax.nn.sigmoid(gi[1] + gh[1])
            n = jnp.tanh(gi[2] + r * gh[2])
            h_new = (1.0 - z) * n + z * h
            return h_new, h_new

        h_last, y_g = jax.lax.scan(cell, h_init, xg.transpose(1, 0, 2))
        ys.append(y_g.transpose(1, 0, 2))
        hs.append(h_last)
    return jnp.concatenate(ys, -1), jnp.concatenate(hs, -1)[None]


# ----------------------------------------------------------------------------
if __name__ == "__main__":
    batch, seq, input_size, hidden_size = 2, 8, 64, 64

    key = jax.random.PRNGKey(0)
    kx, kp = jax.random.split(key)
    x = jax.random.normal(kx, (batch, seq, input_size), jnp.float32)
    params = make_grnn_params(kp, input_size, hidden_size)

    y, h = jax.jit(grnn_forward)(x, params)
    y, h = jax.block_until_ready((y, h))

    assert y.shape == (batch, seq, hidden_size), y.shape
    assert h.shape == (1, batch, hidden_size), h.shape
    assert bool(jnp.all(jnp.isfinite(y))) and bool(jnp.all(jnp.isfinite(h)))

    y_ref, h_ref = grnn_reference(x, params)
    assert jnp.allclose(y, y_ref, atol=1e-2, rtol=1e-2), float(
        jnp.max(jnp.abs(y - y_ref)))
    assert jnp.allclose(h, h_ref, atol=1e-2, rtol=1e-2), float(
        jnp.max(jnp.abs(h - h_ref)))

    print("KERNEL_OK")
</pallas_src>

<mosaic_0001>
module attributes {stable_mosaic.version = 11 : i64} {
  func.func @_grnn_kernel(%arg0: i32, %arg1: memref<16x64xbf16, #tpu.memory_space<vmem>>, %arg2: memref<3x64x64xbf16, #tpu.memory_space<vmem>>, %arg3: memref<3x64x64xbf16, #tpu.memory_space<vmem>>, %arg4: memref<3x1x64xf32, #tpu.memory_space<vmem>>, %arg5: memref<3x1x64xf32, #tpu.memory_space<vmem>>, %arg6: memref<2x64xf32, #tpu.memory_space<vmem>>, %arg7: memref<16x64xf32, #tpu.memory_space<vmem>>, %arg8: memref<2x64xf32, #tpu.memory_space<vmem>>, %arg9: memref<16x64xf32, #tpu.memory_space<vmem>>, %arg10: memref<16x64xf32, #tpu.memory_space<vmem>>, %arg11: memref<16x64xf32, #tpu.memory_space<vmem>>) attributes {dimension_semantics = [#tpu.dimension_semantics<arbitrary>], iteration_bounds = array<i64: 1>, scalar_prefetch = 0 : i64, scratch_operands = 3 : i64, tpu.core_type = #tpu.core_type<tc>, window_params = [{pipeline_mode = #tpu.pipeline_mode<synchronous>, transform_indices = @transform_0, window_bounds = array<i64: 16, 64>}, {pipeline_mode = #tpu.pipeline_mode<synchronous>, transform_indices = @transform_1, window_bounds = array<i64: 3, 64, 64>}, {pipeline_mode = #tpu.pipeline_mode<synchronous>, transform_indices = @transform_2, window_bounds = array<i64: 3, 64, 64>}, {pipeline_mode = #tpu.pipeline_mode<synchronous>, transform_indices = @transform_3, window_bounds = array<i64: 3, 1, 64>}, {pipeline_mode = #tpu.pipeline_mode<synchronous>, transform_indices = @transform_4, window_bounds = array<i64: 3, 1, 64>}, {pipeline_mode = #tpu.pipeline_mode<synchronous>, transform_indices = @transform_5, window_bounds = array<i64: 2, 64>}, {pipeline_mode = #tpu.pipeline_mode<synchronous>, transform_indices = @transform_6, window_bounds = array<i64: 16, 64>}, {pipeline_mode = #tpu.pipeline_mode<synchronous>, transform_indices = @transform_7, window_bounds = array<i64: 2, 64>}]} {
    %c0 = arith.constant 0 : index
    %c0_0 = arith.constant 0 : index
    %0 = vector.load %arg1[%c0, %c0_0] : memref<16x64xbf16, #tpu.memory_space<vmem>>, vector<16x64xbf16>
    %c0_1 = arith.constant 0 : index
    %c0_2 = arith.constant 0 : index
    %c0_3 = arith.constant 0 : index
    %1 = vector.load %arg2[%c0_1, %c0_2, %c0_3] : memref<3x64x64xbf16, #tpu.memory_space<vmem>>, vector<1x64x64xbf16>
    %2 = vector.shape_cast %1 : vector<1x64x64xbf16> to vector<64x64xbf16>
    %cst = arith.constant dense<0.000000e+00> : vector<16x64xf32>
    %3 = tpu.matmul %0, %2, %cst {dimension_numbers = #tpu.dot_dimension_numbers<[1], [0], [0], [1], [0, 0, 1, 1], [], []>} : vector<16x64xbf16>, vector<64x64xbf16>, vector<16x64xf32> -> vector<16x64xf32>
    %c0_4 = arith.constant 0 : index
    %c0_5 = arith.constant 0 : index
    %c0_6 = arith.constant 0 : index
    %4 = vector.load %arg4[%c0_4, %c0_5, %c0_6] : memref<3x1x64xf32, #tpu.memory_space<vmem>>, vector<1x1x64xf32>
    %5 = vector.shape_cast %4 : vector<1x1x64xf32> to vector<1x64xf32>
    %6 = vector.broadcast %5 : vector<1x64xf32> to vector<16x64xf32>
    %7 = arith.addf %3, %6 : vector<16x64xf32>
    %c0_7 = arith.constant 0 : index
    %c0_8 = arith.constant 0 : index
    %c0_9 = arith.constant 0 : index
    %8 = vector.load %arg5[%c0_7, %c0_8, %c0_9] : memref<3x1x64xf32, #tpu.memory_space<vmem>>, vector<1x1x64xf32>
    %9 = vector.shape_cast %8 : vector<1x1x64xf32> to vector<1x64xf32>
    %10 = vector.broadcast %9 : vector<1x64xf32> to vector<16x64xf32>
    %11 = arith.addf %7, %10 : vector<16x64xf32>
    %c0_10 = arith.constant 0 : index
    %c0_11 = arith.constant 0 : index
    %12 = vector.load %arg9[%c0_10, %c0_11] : memref<16x64xf32, #tpu.memory_space<vmem>>, vector<16x64xf32>
    tpu.vector_store %arg9[%c0_10, %c0_11], %11 {strides = array<i32>} : memref<16x64xf32, #tpu.memory_space<vmem>>, vector<16x64xf32>,
    %c1 = arith.constant 1 : index
    %c0_12 = arith.constant 0 : index
    %c0_13 = arith.constant 0 : index
    %13 = vector.load %arg2[%c1, %c0_12, %c0_13] : memref<3x64x64xbf16, #tpu.memory_space<vmem>>, vector<1x64x64xbf16>
    %14 = vector.shape_cast %13 : vector<1x64x64xbf16> to vector<64x64xbf16>
    %cst_14 = arith.constant dense<0.000000e+00> : vector<16x64xf32>
    %15 = tpu.matmul %0, %14, %cst_14 {dimension_numbers = #tpu.dot_dimension_numbers<[1], [0], [0], [1], [0, 0, 1, 1], [], []>} : vector<16x64xbf16>, vector<64x64xbf16>, vector<16x64xf32> -> vector<16x64xf32>
    %c1_15 = arith.constant 1 : index
    %c0_16 = arith.constant 0 : index
    %c0_17 = arith.constant 0 : index
    %16 = vector.load %arg4[%c1_15, %c0_16, %c0_17] : memref<3x1x64xf32, #tpu.memory_space<vmem>>, vector<1x1x64xf32>
    %17 = vector.shape_cast %16 : vector<1x1x64xf32> to vector<1x64xf32>
    %18 = vector.broadcast %17 : vector<1x64xf32> to vector<16x64xf32>
    %19 = arith.addf %15, %18 : vector<16x64xf32>
    %c1_18 = arith.constant 1 : index
    %c0_19 = arith.constant 0 : index
    %c0_20 = arith.constant 0 : index
    %20 = vector.load %arg5[%c1_18, %c0_19, %c0_20] : memref<3x1x64xf32, #tpu.memory_space<vmem>>, vector<1x1x64xf32>
    %21 = vector.shape_cast %20 : vector<1x1x64xf32> to vector<1x64xf32>
    %22 = vector.broadcast %21 : vector<1x64xf32> to vector<16x64xf32>
    %23 = arith.addf %19, %22 : vector<16x64xf32>
    %c0_21 = arith.constant 0 : index
    %c0_22 = arith.constant 0 : index
    %24 = vector.load %arg10[%c0_21, %c0_22] : memref<16x64xf32, #tpu.memory_space<vmem>>, vector<16x64xf32>
    tpu.vector_store %arg10[%c0_21, %c0_22], %23 {strides = array<i32>} : memref<16x64xf32, #tpu.memory_space<vmem>>, vector<16x64xf32>,
    %c2 = arith.constant 2 : index
    %c0_23 = arith.constant 0 : index
    %c0_24 = arith.constant 0 : index
    %25 = vector.load %arg2[%c2, %c0_23, %c0_24] : memref<3x64x64xbf16, #tpu.memory_space<vmem>>, vector<1x64x64xbf16>
    %26 = vector.shape_cast %25 : vector<1x64x64xbf16> to vector<64x64xbf16>
    %cst_25 = arith.constant dense<0.000000e+00> : vector<16x64xf32>
    %27 = tpu.matmul %0, %26, %cst_25 {dimension_numbers = #tpu.dot_dimension_numbers<[1], [0], [0], [1], [0, 0, 1, 1], [], []>} : vector<16x64xbf16>, vector<64x64xbf16>, vector<16x64xf32> -> vector<16x64xf32>
    %c2_26 = arith.constant 2 : index
    %c0_27 = arith.constant 0 : index
    %c0_28 = arith.constant 0 : index
    %28 = vector.load %arg4[%c2_26, %c0_27, %c0_28] : memref<3x1x64xf32, #tpu.memory_space<vmem>>, vector<1x1x64xf32>
    %29 = vector.shape_cast %28 : vector<1x1x64xf32> to vector<1x64xf32>
    %30 = vector.broadcast %29 : vector<1x64xf32> to vector<16x64xf32>
    %31 = arith.addf %27, %30 : vector<16x64xf32>
    %c0_29 = arith.constant 0 : index
    %c0_30 = arith.constant 0 : index
    %32 = vector.load %arg11[%c0_29, %c0_30] : memref<16x64xf32, #tpu.memory_space<vmem>>, vector<16x64xf32>
    tpu.vector_store %arg11[%c0_29, %c0_30], %31 {strides = array<i32>} : memref<16x64xf32, #tpu.memory_space<vmem>>, vector<16x64xf32>,
    %c0_31 = arith.constant 0 : index
    %c0_32 = arith.constant 0 : index
    %c0_33 = arith.constant 0 : index
    %33 = vector.load %arg3[%c0_31, %c0_32, %c0_33] : memref<3x64x64xbf16, #tpu.memory_space<vmem>>, vector<1x64x64xbf16>
    %34 = vector.shape_cast %33 : vector<1x64x64xbf16> to vector<64x64xbf16>
    %c1_34 = arith.constant 1 : index
    %c0_35 = arith.constant 0 : index
    %c0_36 = arith.constant 0 : index
    %35 = vector.load %arg3[%c1_34, %c0_35, %c0_36] : memref<3x64x64xbf16, #tpu.memory_space<vmem>>, vector<1x64x64xbf16>
    %36 = vector.shape_cast %35 : vector<1x64x64xbf16> to vector<64x64xbf16>
    %c2_37 = arith.constant 2 : index
    %c0_38 = arith.constant 0 : index
    %c0_39 = arith.constant 0 : index
    %37 = vector.load %arg3[%c2_37, %c0_38, %c0_39] : memref<3x64x64xbf16, #tpu.memory_space<vmem>>, vector<1x64x64xbf16>
    %38 = vector.shape_cast %37 : vector<1x64x64xbf16> to vector<64x64xbf16>
    %c2_40 = arith.constant 2 : index
    %c0_41 = arith.constant 0 : index
    %c0_42 = arith.constant 0 : index
    %39 = vector.load %arg5[%c2_40, %c0_41, %c0_42] : memref<3x1x64xf32, #tpu.memory_space<vmem>>, vector<1x1x64xf32>
    %40 = vector.shape_cast %39 : vector<1x1x64xf32> to vector<1x64xf32>
    %41 = vector.shape_cast %40 : vector<1x64xf32> to vector<1x64xf32>
    %42 = vector.broadcast %41 : vector<1x64xf32> to vector<2x64xf32>
    %c0_43 = arith.constant 0 : index
    %c0_44 = arith.constant 0 : index
    %43 = vector.load %arg6[%c0_43, %c0_44] : memref<2x64xf32, #tpu.memory_space<vmem>>, vector<2x64xf32>
    %c0_i32 = arith.constant 0 : i32
    %c8_i32 = arith.constant 8 : i32
    %44 = arith.muli %c0_i32, %c8_i32 : i32
    %45 = tpu.assume_multiple %44, 8 : i32
    %46 = arith.index_cast %45 : i32 to index
    %c0_45 = arith.constant 0 : index
    %47 = vector.load %arg9[%46, %c0_45] : memref<16x64xf32, #tpu.memory_space<vmem>>, vector<8x64xf32>
    %48 = arith.index_cast %45 : i32 to index
    %c0_46 = arith.constant 0 : index
    %49 = vector.load %arg10[%48, %c0_46] : memref<16x64xf32, #tpu.memory_space<vmem>>, vector<8x64xf32>
    %50 = arith.index_cast %45 : i32 to index
    %c0_47 = arith.constant 0 : index
    %51 = vector.load %arg11[%50, %c0_47] : memref<16x64xf32, #tpu.memory_space<vmem>>, vector<8x64xf32>
    %52 = arith.truncf %43 : vector<2x64xf32> to vector<2x64xbf16>
    %cst_48 = arith.constant dense<0.000000e+00> : vector<2x64xf32>
    %53 = tpu.matmul %52, %34, %cst_48 {dimension_numbers = #tpu.dot_dimension_numbers<[1], [0], [0], [1], [0, 0, 1, 1], [], []>} : vector<2x64xbf16>, vector<64x64xbf16>, vector<2x64xf32> -> vector<2x64xf32>
    %cst_49 = arith.constant dense<0.000000e+00> : vector<2x64xf32>
    %54 = tpu.matmul %52, %36, %cst_49 {dimension_numbers = #tpu.dot_dimension_numbers<[1], [0], [0], [1], [0, 0, 1, 1], [], []>} : vector<2x64xbf16>, vector<64x64xbf16>, vector<2x64xf32> -> vector<2x64xf32>
    %cst_50 = arith.constant dense<0.000000e+00> : vector<2x64xf32>
    %55 = tpu.matmul %52, %38, %cst_50 {dimension_numbers = #tpu.dot_dimension_numbers<[1], [0], [0], [1], [0, 0, 1, 1], [], []>} : vector<2x64xbf16>, vector<64x64xbf16>, vector<2x64xf32> -> vector<2x64xf32>
    %56 = arith.addf %55, %42 : vector<2x64xf32>
    %57 = vector.extract_strided_slice %47 {offsets = [0, 0], sizes = [2, 64], strides = [1, 1]} : vector<8x64xf32> to vector<2x64xf32>
    %58 = arith.addf %57, %53 : vector<2x64xf32>
    %59 = arith.negf %58 : vector<2x64xf32>
    %60 = math.exp %59 : vector<2x64xf32>
    %cst_51 = arith.constant 1.000000e+00 : f32
    %61 = vector.broadcast %cst_51 : f32 to vector<2x64xf32>
    %62 = arith.addf %61, %60 : vector<2x64xf32>
    %63 = arith.divf %61, %62 : vector<2x64xf32>
    %64 = vector.extract_strided_slice %49 {offsets = [0, 0], sizes = [2, 64], strides = [1, 1]} : vector<8x64xf32> to vector<2x64xf32>
    %65 = arith.addf %64, %54 : vector<2x64xf32>
    %66 = arith.negf %65 : vector<2x64xf32>
    %67 = math.exp %66 : vector<2x64xf32>
    %cst_52 = arith.constant 1.000000e+00 : f32
    %68 = vector.broadcast %cst_52 : f32 to vector<2x64xf32>
    %69 = arith.addf %68, %67 : vector<2x64xf32>
    %70 = arith.divf %68, %69 : vector<2x64xf32>
    %71 = vector.extract_strided_slice %51 {offsets = [0, 0], sizes = [2, 64], strides = [1, 1]} : vector<8x64xf32> to vector<2x64xf32>
    %72 = arith.mulf %63, %56 : vector<2x64xf32>
    %73 = arith.addf %71, %72 : vector<2x64xf32>
    %74 = math.tanh %73 : vector<2x64xf32>
    %cst_53 = arith.constant 1.000000e+00 : f32
    %75 = vector.broadcast %cst_53 : f32 to vector<2x64xf32>
    %76 = arith.subf %75, %70 : vector<2x64xf32>
    %77 = arith.mulf %76, %74 : vector<2x64xf32>
    %78 = arith.mulf %70, %43 : vector<2x64xf32>
    %79 = arith.addf %77, %78 : vector<2x64xf32>
    %80 = arith.truncf %79 : vector<2x64xf32> to vector<2x64xbf16>
    %cst_54 = arith.constant dense<0.000000e+00> : vector<2x64xf32>
    %81 = tpu.matmul %80, %34, %cst_54 {dimension_numbers = #tpu.dot_dimension_numbers<[1], [0], [0], [1], [0, 0, 1, 1], [], []>} : vector<2x64xbf16>, vector<64x64xbf16>, vector<2x64xf32> -> vector<2x64xf32>
    %cst_55 = arith.constant dense<0.000000e+00> : vector<2x64xf32>
    %82 = tpu.matmul %80, %36, %cst_55 {dimension_numbers = #tpu.dot_dimension_numbers<[1], [0], [0], [1], [0, 0, 1, 1], [], []>} : vector<2x64xbf16>, vector<64x64xbf16>, vector<2x64xf32> -> vector<2x64xf32>
    %cst_56 = arith.constant dense<0.000000e+00> : vector<2x64xf32>
    %83 = tpu.matmul %80, %38, %cst_56 {dimension_numbers = #tpu.dot_dimension_numbers<[1], [0], [0], [1], [0, 0, 1, 1], [], []>} : vector<2x64xbf16>, vector<64x64xbf16>, vector<2x64xf32> -> vector<2x64xf32>
    %84 = arith.addf %83, %42 : vector<2x64xf32>
    %85 = vector.extract_strided_slice %47 {offsets = [2, 0], sizes = [2, 64], strides = [1, 1]} : vector<8x64xf32> to vector<2x64xf32>
    %86 = arith.addf %85, %81 : vector<2x64xf32>
    %87 = arith.negf %86 : vector<2x64xf32>
    %88 = math.exp %87 : vector<2x64xf32>
    %cst_57 = arith.constant 1.000000e+00 : f32
    %89 = vector.broadcast %cst_57 : f32 to vector<2x64xf32>
    %90 = arith.addf %89, %88 : vector<2x64xf32>
    %91 = arith.divf %89, %90 : vector<2x64xf32>
    %92 = vector.extract_strided_slice %49 {offsets = [2, 0], sizes = [2, 64], strides = [1, 1]} : vector<8x64xf32> to vector<2x64xf32>
    %93 = arith.addf %92, %82 : vector<2x64xf32>
    %94 = arith.negf %93 : vector<2x64xf32>
    %95 = math.exp %94 : vector<2x64xf32>
    %cst_58 = arith.constant 1.000000e+00 : f32
    %96 = vector.broadcast %cst_58 : f32 to vector<2x64xf32>
    %97 = arith.addf %96, %95 : vector<2x64xf32>
    %98 = arith.divf %96, %97 : vector<2x64xf32>
    %99 = vector.extract_strided_slice %51 {offsets = [2, 0], sizes = [2, 64], strides = [1, 1]} : vector<8x64xf32> to vector<2x64xf32>
    %100 = arith.mulf %91, %84 : vector<2x64xf32>
    %101 = arith.addf %99, %100 : vector<2x64xf32>
    %102 = math.tanh %101 : vector<2x64xf32>
    %cst_59 = arith.constant 1.000000e+00 : f32
    %103 = vector.broadcast %cst_59 : f32 to vector<2x64xf32>
    %104 = arith.subf %103, %98 : vector<2x64xf32>
    %105 = arith.mulf %104, %102 : vector<2x64xf32>
    %106 = arith.mulf %98, %79 : vector<2x64xf32>
    %107 = arith.addf %105, %106 : vector<2x64xf32>
    %108 = arith.truncf %107 : vector<2x64xf32> to vector<2x64xbf16>
    %cst_60 = arith.constant dense<0.000000e+00> : vector<2x64xf32>
    %109 = tpu.matmul %108, %34, %cst_60 {dimension_numbers = #tpu.dot_dimension_numbers<[1], [0], [0], [1], [0, 0, 1, 1], [], []>} : vector<2x64xbf16>, vector<64x64xbf16>, vector<2x64xf32> -> vector<2x64xf32>
    %cst_61 = arith.constant dense<0.000000e+00> : vector<2x64xf32>
    %110 = tpu.matmul %108, %36, %cst_61 {dimension_numbers = #tpu.dot_dimension_numbers<[1], [0], [0], [1], [0, 0, 1, 1], [], []>} : vector<2x64xbf16>, vector<64x64xbf16>, vector<2x64xf32> -> vector<2x64xf32>
    %cst_62 = arith.constant dense<0.000000e+00> : vector<2x64xf32>
    %111 = tpu.matmul %108, %38, %cst_62 {dimension_numbers = #tpu.dot_dimension_numbers<[1], [0], [0], [1], [0, 0, 1, 1], [], []>} : vector<2x64xbf16>, vector<64x64xbf16>, vector<2x64xf32> -> vector<2x64xf32>
    %112 = arith.addf %111, %42 : vector<2x64xf32>
    %113 = vector.extract_strided_slice %47 {offsets = [4, 0], sizes = [2, 64], strides = [1, 1]} : vector<8x64xf32> to vector<2x64xf32>
    %114 = arith.addf %113, %109 : vector<2x64xf32>
    %115 = arith.negf %114 : vector<2x64xf32>
    %116 = math.exp %115 : vector<2x64xf32>
    %cst_63 = arith.constant 1.000000e+00 : f32
    %117 = vector.broadcast %cst_63 : f32 to vector<2x64xf32>
    %118 = arith.addf %117, %116 : vector<2x64xf32>
    %119 = arith.divf %117, %118 : vector<2x64xf32>
    %120 = vector.extract_strided_slice %49 {offsets = [4, 0], sizes = [2, 64], strides = [1, 1]} : vector<8x64xf32> to vector<2x64xf32>
    %121 = arith.addf %120, %110 : vector<2x64xf32>
    %122 = arith.negf %121 : vector<2x64xf32>
    %123 = math.exp %122 : vector<2x64xf32>
    %cst_64 = arith.constant 1.000000e+00 : f32
    %124 = vector.broadcast %cst_64 : f32 to vector<2x64xf32>
    %125 = arith.addf %124, %123 : vector<2x64xf32>
    %126 = arith.divf %124, %125 : vector<2x64xf32>
    %127 = vector.extract_strided_slice %51 {offsets = [4, 0], sizes = [2, 64], strides = [1, 1]} : vector<8x64xf32> to vector<2x64xf32>
    %128 = arith.mulf %119, %112 : vector<2x64xf32>
    %129 = arith.addf %127, %128 : vector<2x64xf32>
    %130 = math.tanh %129 : vector<2x64xf32>
    %cst_65 = arith.constant 1.000000e+00 : f32
    %131 = vector.broadcast %cst_65 : f32 to vector<2x64xf32>
    %132 = arith.subf %131, %126 : vector<2x64xf32>
    %133 = arith.mulf %132, %130 : vector<2x64xf32>
    %134 = arith.mulf %126, %107 : vector<2x64xf32>
    %135 = arith.addf %133, %134 : vector<2x64xf32>
    %136 = arith.truncf %135 : vector<2x64xf32> to vector<2x64xbf16>
    %cst_66 = arith.constant dense<0.000000e+00> : vector<2x64xf32>
    %137 = tpu.matmul %136, %34, %cst_66 {dimension_numbers = #tpu.dot_dimension_numbers<[1], [0], [0], [1], [0, 0, 1, 1], [], []>} : vector<2x64xbf16>, vector<64x64xbf16>, vector<2x64xf32> -> vector<2x64xf32>
    %cst_67 = arith.constant dense<0.000000e+00> : vector<2x64xf32>
    %138 = tpu.matmul %136, %36, %cst_67 {dimension_numbers = #tpu.dot_dimension_numbers<[1], [0], [0], [1], [0, 0, 1, 1], [], []>} : vector<2x64xbf16>, vector<64x64xbf16>, vector<2x64xf32> -> vector<2x64xf32>
    %cst_68 = arith.constant dense<0.000000e+00> : vector<2x64xf32>
    %139 = tpu.matmul %136, %38, %cst_68 {dimension_numbers = #tpu.dot_dimension_numbers<[1], [0], [0], [1], [0, 0, 1, 1], [], []>} : vector<2x64xbf16>, vector<64x64xbf16>, vector<2x64xf32> -> vector<2x64xf32>
    %140 = arith.addf %139, %42 : vector<2x64xf32>
    %141 = vector.extract_strided_slice %47 {offsets = [6, 0], sizes = [2, 64], strides = [1, 1]} : vector<8x64xf32> to vector<2x64xf32>
    %142 = arith.addf %141, %137 : vector<2x64xf32>
    %143 = arith.negf %142 : vector<2x64xf32>
    %144 = math.exp %143 : vector<2x64xf32>
    %cst_69 = arith.constant 1.000000e+00 : f32
    %145 = vector.broadcast %cst_69 : f32 to vector<2x64xf32>
    %146 = arith.addf %145, %144 : vector<2x64xf32>
    %147 = arith.divf %145, %146 : vector<2x64xf32>
    %148 = vector.extract_strided_slice %49 {offsets = [6, 0], sizes = [2, 64], strides = [1, 1]} : vector<8x64xf32> to vector<2x64xf32>
    %149 = arith.addf %148, %138 : vector<2x64xf32>
    %150 = arith.negf %149 : vector<2x64xf32>
    %151 = math.exp %150 : vector<2x64xf32>
    %cst_70 = arith.constant 1.000000e+00 : f32
    %152 = vector.broadcast %cst_70 : f32 to vector<2x64xf32>
    %153 = arith.addf %152, %151 : vector<2x64xf32>
    %154 = arith.divf %152, %153 : vector<2x64xf32>
    %155 = vector.extract_strided_slice %51 {offsets = [6, 0], sizes = [2, 64], strides = [1, 1]} : vector<8x64xf32> to vector<2x64xf32>
    %156 = arith.mulf %147, %140 : vector<2x64xf32>
    %157 = arith.addf %155, %156 : vector<2x64xf32>
    %158 = math.tanh %157 : vector<2x64xf32>
    %cst_71 = arith.constant 1.000000e+00 : f32
    %159 = vector.broadcast %cst_71 : f32 to vector<2x64xf32>
    %160 = arith.subf %159, %154 : vector<2x64xf32>
    %161 = arith.mulf %160, %158 : vector<2x64xf32>
    %162 = arith.mulf %154, %135 : vector<2x64xf32>
    %163 = arith.addf %161, %162 : vector<2x64xf32>
    %164 = tpu.concatenate %79, %107, %135, %163 in 0 : vector<2x64xf32>, vector<2x64xf32>, vector<2x64xf32>, vector<2x64xf32> -> vector<8x64xf32>
    %165 = arith.index_cast %45 : i32 to index
    %c0_72 = arith.constant 0 : index
    %166 = vector.load %arg7[%165, %c0_72] : memref<16x64xf32, #tpu.memory_space<vmem>>, vector<8x64xf32>
    tpu.vector_store %arg7[%165, %c0_72], %164 {strides = array<i32>} : memref<16x64xf32, #tpu.memory_space<vmem>>, vector<8x64xf32>,
    %c1_i32 = arith.constant 1 : i32
    %c8_i32_73 = arith.constant 8 : i32
    %167 = arith.muli %c1_i32, %c8_i32_73 : i32
    %168 = tpu.assume_multiple %167, 8 : i32
    %169 = arith.index_cast %168 : i32 to index
    %c0_74 = arith.constant 0 : index
    %170 = vector.load %arg9[%169, %c0_74] : memref<16x64xf32, #tpu.memory_space<vmem>>, vector<8x64xf32>
    %171 = arith.index_cast %168 : i32 to index
    %c0_75 = arith.constant 0 : index
    %172 = vector.load %arg10[%171, %c0_75] : memref<16x64xf32, #tpu.memory_space<vmem>>, vector<8x64xf32>
    %173 = arith.index_cast %168 : i32 to index
    %c0_76 = arith.constant 0 : index
    %174 = vector.load %arg11[%173, %c0_76] : memref<16x64xf32, #tpu.memory_space<vmem>>, vector<8x64xf32>
    %175 = arith.truncf %163 : vector<2x64xf32> to vector<2x64xbf16>
    %cst_77 = arith.constant dense<0.000000e+00> : vector<2x64xf32>
    %176 = tpu.matmul %175, %34, %cst_77 {dimension_numbers = #tpu.dot_dimension_numbers<[1], [0], [0], [1], [0, 0, 1, 1], [], []>} : vector<2x64xbf16>, vector<64x64xbf16>, vector<2x64xf32> -> vector<2x64xf32>
    %cst_78 = arith.constant dense<0.000000e+00> : vector<2x64xf32>
    %177 = tpu.matmul %175, %36, %cst_78 {dimension_numbers = #tpu.dot_dimension_numbers<[1], [0], [0], [1], [0, 0, 1, 1], [], []>} : vector<2x64xbf16>, vector<64x64xbf16>, vector<2x64xf32> -> vector<2x64xf32>
    %cst_79 = arith.constant dense<0.000000e+00> : vector<2x64xf32>
    %178 = tpu.matmul %175, %38, %cst_79 {dimension_numbers = #tpu.dot_dimension_numbers<[1], [0], [0], [1], [0, 0, 1, 1], [], []>} : vector<2x64xbf16>, vector<64x64xbf16>, vector<2x64xf32> -> vector<2x64xf32>
    %179 = arith.addf %178, %42 : vector<2x64xf32>
    %180 = vector.extract_strided_slice %170 {offsets = [0, 0], sizes = [2, 64], strides = [1, 1]} : vector<8x64xf32> to vector<2x64xf32>
    %181 = arith.addf %180, %176 : vector<2x64xf32>
    %182 = arith.negf %181 : vector<2x64xf32>
    %183 = math.exp %182 : vector<2x64xf32>
    %cst_80 = arith.constant 1.000000e+00 : f32
    %184 = vector.broadcast %cst_80 : f32 to vector<2x64xf32>
    %185 = arith.addf %184, %183 : vector<2x64xf32>
    %186 = arith.divf %184, %185 : vector<2x64xf32>
    %187 = vector.extract_strided_slice %172 {offsets = [0, 0], sizes = [2, 64], strides = [1, 1]} : vector<8x64xf32> to vector<2x64xf32>
    %188 = arith.addf %187, %177 : vector<2x64xf32>
    %189 = arith.negf %188 : vector<2x64xf32>
    %190 = math.exp %189 : vector<2x64xf32>
    %cst_81 = arith.constant 1.000000e+00 : f32
    %191 = vector.broadcast %cst_81 : f32 to vector<2x64xf32>
    %192 = arith.addf %191, %190 : vector<2x64xf32>
    %193 = arith.divf %191, %192 : vector<2x64xf32>
    %194 = vector.extract_strided_slice %174 {offsets = [0, 0], sizes = [2, 64], strides = [1, 1]} : vector<8x64xf32> to vector<2x64xf32>
    %195 = arith.mulf %186, %179 : vector<2x64xf32>
    %196 = arith.addf %194, %195 : vector<2x64xf32>
    %197 = math.tanh %196 : vector<2x64xf32>
    %cst_82 = arith.constant 1.000000e+00 : f32
    %198 = vector.broadcast %cst_82 : f32 to vector<2x64xf32>
    %199 = arith.subf %198, %193 : vector<2x64xf32>
    %200 = arith.mulf %199, %197 : vector<2x64xf32>
    %201 = arith.mulf %193, %163 : vector<2x64xf32>
    %202 = arith.addf %200, %201 : vector<2x64xf32>
    %203 = arith.truncf %202 : vector<2x64xf32> to vector<2x64xbf16>
    %cst_83 = arith.constant dense<0.000000e+00> : vector<2x64xf32>
    %204 = tpu.matmul %203, %34, %cst_83 {dimension_numbers = #tpu.dot_dimension_numbers<[1], [0], [0], [1], [0, 0, 1, 1], [], []>} : vector<2x64xbf16>, vector<64x64xbf16>, vector<2x64xf32> -> vector<2x64xf32>
    %cst_84 = arith.constant dense<0.000000e+00> : vector<2x64xf32>
    %205 = tpu.matmul %203, %36, %cst_84 {dimension_numbers = #tpu.dot_dimension_numbers<[1], [0], [0], [1], [0, 0, 1, 1], [], []>} : vector<2x64xbf16>, vector<64x64xbf16>, vector<2x64xf32> -> vector<2x64xf32>
    %cst_85 = arith.constant dense<0.000000e+00> : vector<2x64xf32>
    %206 = tpu.matmul %203, %38, %cst_85 {dimension_numbers = #tpu.dot_dimension_numbers<[1], [0], [0], [1], [0, 0, 1, 1], [], []>} : vector<2x64xbf16>, vector<64x64xbf16>, vector<2x64xf32> -> vector<2x64xf32>
    %207 = arith.addf %206, %42 : vector<2x64xf32>
    %208 = vector.extract_strided_slice %170 {offsets = [2, 0], sizes = [2, 64], strides = [1, 1]} : vector<8x64xf32> to vector<2x64xf32>
    %209 = arith.addf %208, %204 : vector<2x64xf32>
    %210 = arith.negf %209 : vector<2x64xf32>
    %211 = math.exp %210 : vector<2x64xf32>
    %cst_86 = arith.constant 1.000000e+00 : f32
    %212 = vector.broadcast %cst_86 : f32 to vector<2x64xf32>
    %213 = arith.addf %212, %211 : vector<2x64xf32>
    %214 = arith.divf %212, %213 : vector<2x64xf32>
    %215 = vector.extract_strided_slice %172 {offsets = [2, 0], sizes = [2, 64], strides = [1, 1]} : vector<8x64xf32> to vector<2x64xf32>
    %216 = arith.addf %215, %205 : vector<2x64xf32>
    %217 = arith.negf %216 : vector<2x64xf32>
    %218 = math.exp %217 : vector<2x64xf32>
    %cst_87 = arith.constant 1.000000e+00 : f32
    %219 = vector.broadcast %cst_87 : f32 to vector<2x64xf32>
    %220 = arith.addf %219, %218 : vector<2x64xf32>
    %221 = arith.divf %219, %220 : vector<2x64xf32>
    %222 = vector.extract_strided_slice %174 {offsets = [2, 0], sizes = [2, 64], strides = [1, 1]} : vector<8x64xf32> to vector<2x64xf32>
    %223 = arith.mulf %214, %207 : vector<2x64xf32>
    %224 = arith.addf %222, %223 : vector<2x64xf32>
    %225 = math.tanh %224 : vector<2x64xf32>
    %cst_88 = arith.constant 1.000000e+00 : f32
    %226 = vector.broadcast %cst_88 : f32 to vector<2x64xf32>
    %227 = arith.subf %226, %221 : vector<2x64xf32>
    %228 = arith.mulf %227, %225 : vector<2x64xf32>
    %229 = arith.mulf %221, %202 : vector<2x64xf32>
    %230 = arith.addf %228, %229 : vector<2x64xf32>
    %231 = arith.truncf %230 : vector<2x64xf32> to vector<2x64xbf16>
    %cst_89 = arith.constant dense<0.000000e+00> : vector<2x64xf32>
    %232 = tpu.matmul %231, %34, %cst_89 {dimension_numbers = #tpu.dot_dimension_numbers<[1], [0], [0], [1], [0, 0, 1, 1], [], []>} : vector<2x64xbf16>, vector<64x64xbf16>, vector<2x64xf32> -> vector<2x64xf32>
    %cst_90 = arith.constant dense<0.000000e+00> : vector<2x64xf32>
    %233 = tpu.matmul %231, %36, %cst_90 {dimension_numbers = #tpu.dot_dimension_numbers<[1], [0], [0], [1], [0, 0, 1, 1], [], []>} : vector<2x64xbf16>, vector<64x64xbf16>, vector<2x64xf32> -> vector<2x64xf32>
    %cst_91 = arith.constant dense<0.000000e+00> : vector<2x64xf32>
    %234 = tpu.matmul %231, %38, %cst_91 {dimension_numbers = #tpu.dot_dimension_numbers<[1], [0], [0], [1], [0, 0, 1, 1], [], []>} : vector<2x64xbf16>, vector<64x64xbf16>, vector<2x64xf32> -> vector<2x64xf32>
    %235 = arith.addf %234, %42 : vector<2x64xf32>
    %236 = vector.extract_strided_slice %170 {offsets = [4, 0], sizes = [2, 64], strides = [1, 1]} : vector<8x64xf32> to vector<2x64xf32>
    %237 = arith.addf %236, %232 : vector<2x64xf32>
    %238 = arith.negf %237 : vector<2x64xf32>
    %239 = math.exp %238 : vector<2x64xf32>
    %cst_92 = arith.constant 1.000000e+00 : f32
    %240 = vector.broadcast %cst_92 : f32 to vector<2x64xf32>
    %241 = arith.addf %240, %239 : vector<2x64xf32>
    %242 = arith.divf %240, %241 : vector<2x64xf32>
    %243 = vector.extract_strided_slice %172 {offsets = [4, 0], sizes = [2, 64], strides = [1, 1]} : vector<8x64xf32> to vector<2x64xf32>
    %244 = arith.addf %243, %233 : vector<2x64xf32>
    %245 = arith.negf %244 : vector<2x64xf32>
    %246 = math.exp %245 : vector<2x64xf32>
    %cst_93 = arith.constant 1.000000e+00 : f32
    %247 = vector.broadcast %cst_93 : f32 to vector<2x64xf32>
    %248 = arith.addf %247, %246 : vector<2x64xf32>
    %249 = arith.divf %247, %248 : vector<2x64xf32>
    %250 = vector.extract_strided_slice %174 {offsets = [4, 0], sizes = [2, 64], strides = [1, 1]} : vector<8x64xf32> to vector<2x64xf32>
    %251 = arith.mulf %242, %235 : vector<2x64xf32>
    %252 = arith.addf %250, %251 : vector<2x64xf32>
    %253 = math.tanh %252 : vector<2x64xf32>
    %cst_94 = arith.constant 1.000000e+00 : f32
    %254 = vector.broadcast %cst_94 : f32 to vector<2x64xf32>
    %255 = arith.subf %254, %249 : vector<2x64xf32>
    %256 = arith.mulf %255, %253 : vector<2x64xf32>
    %257 = arith.mulf %249, %230 : vector<2x64xf32>
    %258 = arith.addf %256, %257 : vector<2x64xf32>
    %259 = arith.truncf %258 : vector<2x64xf32> to vector<2x64xbf16>
    %cst_95 = arith.constant dense<0.000000e+00> : vector<2x64xf32>
    %260 = tpu.matmul %259, %34, %cst_95 {dimension_numbers = #tpu.dot_dimension_numbers<[1], [0], [0], [1], [0, 0, 1, 1], [], []>} : vector<2x64xbf16>, vector<64x64xbf16>, vector<2x64xf32> -> vector<2x64xf32>
    %cst_96 = arith.constant dense<0.000000e+00> : vector<2x64xf32>
    %261 = tpu.matmul %259, %36, %cst_96 {dimension_numbers = #tpu.dot_dimension_numbers<[1], [0], [0], [1], [0, 0, 1, 1], [], []>} : vector<2x64xbf16>, vector<64x64xbf16>, vector<2x64xf32> -> vector<2x64xf32>
    %cst_97 = arith.constant dense<0.000000e+00> : vector<2x64xf32>
    %262 = tpu.matmul %259, %38, %cst_97 {dimension_numbers = #tpu.dot_dimension_numbers<[1], [0], [0], [1], [0, 0, 1, 1], [], []>} : vector<2x64xbf16>, vector<64x64xbf16>, vector<2x64xf32> -> vector<2x64xf32>
    %263 = arith.addf %262, %42 : vector<2x64xf32>
    %264 = vector.extract_strided_slice %170 {offsets = [6, 0], sizes = [2, 64], strides = [1, 1]} : vector<8x64xf32> to vector<2x64xf32>
    %265 = arith.addf %264, %260 : vector<2x64xf32>
    %266 = arith.negf %265 : vector<2x64xf32>
    %267 = math.exp %266 : vector<2x64xf32>
    %cst_98 = arith.constant 1.000000e+00 : f32
    %268 = vector.broadcast %cst_98 : f32 to vector<2x64xf32>
    %269 = arith.addf %268, %267 : vector<2x64xf32>
    %270 = arith.divf %268, %269 : vector<2x64xf32>
    %271 = vector.extract_strided_slice %172 {offsets = [6, 0], sizes = [2, 64], strides = [1, 1]} : vector<8x64xf32> to vector<2x64xf32>
    %272 = arith.addf %271, %261 : vector<2x64xf32>
    %273 = arith.negf %272 : vector<2x64xf32>
    %274 = math.exp %273 : vector<2x64xf32>
    %cst_99 = arith.constant 1.000000e+00 : f32
    %275 = vector.broadcast %cst_99 : f32 to vector<2x64xf32>
    %276 = arith.addf %275, %274 : vector<2x64xf32>
    %277 = arith.divf %275, %276 : vector<2x64xf32>
    %278 = vector.extract_strided_slice %174 {offsets = [6, 0], sizes = [2, 64], strides = [1, 1]} : vector<8x64xf32> to vector<2x64xf32>
    %279 = arith.mulf %270, %263 : vector<2x64xf32>
    %280 = arith.addf %278, %279 : vector<2x64xf32>
    %281 = math.tanh %280 : vector<2x64xf32>
    %cst_100 = arith.constant 1.000000e+00 : f32
    %282 = vector.broadcast %cst_100 : f32 to vector<2x64xf32>
    %283 = arith.subf %282, %277 : vector<2x64xf32>
    %284 = arith.mulf %283, %281 : vector<2x64xf32>
    %285 = arith.mulf %277, %258 : vector<2x64xf32>
    %286 = arith.addf %284, %285 : vector<2x64xf32>
    %287 = tpu.concatenate %202, %230, %258, %286 in 0 : vector<2x64xf32>, vector<2x64xf32>, vector<2x64xf32>, vector<2x64xf32> -> vector<8x64xf32>
    %288 = arith.index_cast %168 : i32 to index
    %c0_101 = arith.constant 0 : index
    %289 = vector.load %arg7[%288, %c0_101] : memref<16x64xf32, #tpu.memory_space<vmem>>, vector<8x64xf32>
    tpu.vector_store %arg7[%288, %c0_101], %287 {strides = array<i32>} : memref<16x64xf32, #tpu.memory_space<vmem>>, vector<8x64xf32>,
    %c2_i32 = arith.constant 2 : i32
    %c0_102 = arith.constant 0 : index
    %c0_103 = arith.constant 0 : index
    %290 = vector.load %arg8[%c0_102, %c0_103] : memref<2x64xf32, #tpu.memory_space<vmem>>, vector<2x64xf32>
    tpu.vector_store %arg8[%c0_102, %c0_103], %286 {strides = array<i32>} : memref<2x64xf32, #tpu.memory_space<vmem>>, vector<2x64xf32>,
    return
  }
  func.func @transform_0(%arg0: i32) -> (i32, i32) {
    %c0_i32 = arith.constant 0 : i32
    %c0_i32_0 = arith.constant 0 : i32
    %c0_i32_1 = arith.constant 0 : i32
    return %c0_i32, %c0_i32_0 : i32, i32
  }
  func.func @transform_1(%arg0: i32) -> (i32, i32, i32) {
    %c0_i32 = arith.constant 0 : i32
    %c0_i32_0 = arith.constant 0 : i32
    %c0_i32_1 = arith.constant 0 : i32
    %c0_i32_2 = arith.constant 0 : i32
    return %c0_i32, %c0_i32_0, %c0_i32_1 : i32, i32, i32
  }
  func.func @transform_2(%arg0: i32) -> (i32, i32, i32) {
    %c0_i32 = arith.constant 0 : i32
    %c0_i32_0 = arith.constant 0 : i32
    %c0_i32_1 = arith.constant 0 : i32
    %c0_i32_2 = arith.constant 0 : i32
    return %c0_i32, %c0_i32_0, %c0_i32_1 : i32, i32, i32
  }
  func.func @transform_3(%arg0: i32) -> (i32, i32, i32) {
    %c0_i32 = arith.constant 0 : i32
    %c0_i32_0 = arith.constant 0 : i32
    %c0_i32_1 = arith.constant 0 : i32
    %c0_i32_2 = arith.constant 0 : i32
    return %c0_i32, %c0_i32_0, %c0_i32_1 : i32, i32, i32
  }
  func.func @transform_4(%arg0: i32) -> (i32, i32, i32) {
    %c0_i32 = arith.constant 0 : i32
    %c0_i32_0 = arith.constant 0 : i32
    %c0_i32_1 = arith.constant 0 : i32
    %c0_i32_2 = arith.constant 0 : i32
    return %c0_i32, %c0_i32_0, %c0_i32_1 : i32, i32, i32
  }
  func.func @transform_5(%arg0: i32) -> (i32, i32) {
    %c0_i32 = arith.constant 0 : i32
    %c0_i32_0 = arith.constant 0 : i32
    %c0_i32_1 = arith.constant 0 : i32
    return %c0_i32, %c0_i32_0 : i32, i32
  }
  func.func @transform_6(%arg0: i32) -> (i32, i32) {
    %c0_i32 = arith.constant 0 : i32
    %c0_i32_0 = arith.constant 0 : i32
    %c0_i32_1 = arith.constant 0 : i32
    return %c0_i32, %c0_i32_0 : i32, i32
  }
  func.func @transform_7(%arg0: i32) -> (i32, i32) {
    %c0_i32 = arith.constant 0 : i32
    %c0_i32_0 = arith.constant 0 : i32
    %c0_i32_1 = arith.constant 0 : i32
    return %c0_i32, %c0_i32_0 : i32, i32
  }
}

</mosaic_0001>

<bundles_post_ra>
// kernel: squeeze.1
= control target key start
LH: loop header
LB: loop body
LE: loop exit
PB: predicated region body
PF: predicated region fallthrough
CT: control target
= control target key end

     0   :  { %s20_s0 = inlined_call_operand.<no memory space> [shape: f32[], index: 0, kind: input, shape index: {}]   ;;  %s21_s1 = inlined_call_operand.vmem [shape: f32[2,64], index: 1, kind: output, shape index: {}]  }
   0x1   :  { %v2_v0 = vstv %s20_s0 }
   0x2   :  { %3 = vst [vmem:[%s21_s1] sm:$0x3] %v2_v0 }

// kernel: grnn_forward.1
= control target key start
LH: loop header
LB: loop body
LE: loop exit
PB: predicated region body
PF: predicated region fallthrough
CT: control target
= control target key end

     0   :  { %13 = vsyncpa [#allocation6], 0  ;;  %s2978_s0 = inlined_call_operand.vmem [shape: bf16[16,64], index: 0, kind: input, shape index: {}]   ;;  %s2979_s1 = inlined_call_operand.hbm [shape: bf16[3,64,64], index: 1, kind: input, shape index: {}]   ;;  %s2980_s2 = inlined_call_operand.hbm [shape: bf16[3,64,64], index: 2, kind: input, shape index: {}]   ;;  %s2981_s3 = inlined_call_operand.vmem [shape: f32[3,1,64], index: 3, kind: input, shape index: {}]   ;;  %s2982_s4 = inlined_call_operand.vmem [shape: f32[3,1,64], index: 4, kind: input, shape index: {}]   ;;  %s2983_s5 = inlined_call_operand.vmem [shape: f32[2,64], index: 5, kind: input, shape index: {}]   ;;  %s2984_s6 = inlined_call_operand.vmem [shape: f32[16,64], index: 6, kind: output, shape index: {0}]   ;;  %s2985_s7 = inlined_call_operand.hbm [shape: f32[2,64], index: 7, kind: output, shape index: {1}]  }
   0x1   :  { %14 = vsyncpa [#allocation9], 0 }
   0x2   :  { %15 = vsyncpa [#allocation7], 0  ;;  %s2459_s24 = smov [#allocation5]   ;;  %s2387_s28 = scalar_lea.hbm %s2979_s1, 1536 }
   0x3   :  { %s23_s25 = sshll.u32 %s2459_s24, 4  ;;  %p2388_p0 = scmp.ne.s32.totalorder %s2979_s1, %s2387_s28  ;;  %s24_s25 = int_to_ptr.vmem [resolvable:$true] %s23_s25 }
   0x4   :  { %p2391_p1 = scmp.lt.u32.totalorder %s2387_s28, %s2979_s1 }
   0x6   :  { %p2393_p2 = pnand %p2391_p1, %p2388_p0 }
   0x8   :  { %2396 = shalt.err (!%p2393_p2)
}
   0x9   :  { %s2397_s10 = scalar_lea.vmem %s24_s25, 1536  ;;  %p2402_p4 = scmp.lt.s32.totalorder %s24_s25, %s24_s25 }
   0xa   :  { %p2398_p3 = scmp.ne.s32.totalorder %s24_s25, %s2397_s10  ;;  %p2403_p5 = scmp.lt.s32.totalorder %s2397_s10, %s2397_s10 }
   0xc   :  { %p2404_p6 = por %p2403_p5, %p2402_p4 }
   0xe   :  { %p2405_p7 = pnand %p2404_p6, %p2398_p3 }
  0x10   :  { %2408 = shalt.err (!%p2405_p7)
}
  0x11   :  { %s2460_s11 = smov 64   ;;  %s2461_s12 = smov 4  }
  0x12   :  { %29 = dma.hbm_to_vmem [thread:$0]  %s2979_s1, 1536, %s24_s25, [#allocation6], %s2460_s11, %s2460_s11, %s2461_s12  }
  0x13   :  { %s2462_s15 = smov [#allocation8]   ;;  %s2409_s19 = scalar_lea.hbm %s2980_s2, 1536 }
  0x14   :  { %s35_s16 = sshll.u32 %s2462_s15, 4  ;;  %p2410_p8 = scmp.ne.s32.totalorder %s2980_s2, %s2409_s19  ;;  %s36_s16 = int_to_ptr.vmem [resolvable:$true] %s35_s16 }
  0x15   :  { %p2413_p9 = scmp.lt.u32.totalorder %s2409_s19, %s2980_s2 }
  0x17   :  { %p2415_p10 = pnand %p2413_p9, %p2410_p8 }
  0x19   :  { %2418 = shalt.err (!%p2415_p10)
}
  0x1a   :  { %s2419_s24 = scalar_lea.vmem %s36_s16, 1536  ;;  %p2424_p12 = scmp.lt.s32.totalorder %s36_s16, %s36_s16 }
  0x1b   :  { %p2420_p11 = scmp.ne.s32.totalorder %s36_s16, %s2419_s24  ;;  %p2425_p13 = scmp.lt.s32.totalorder %s2419_s24, %s2419_s24 }
  0x1d   :  { %p2426_p0 = por %p2425_p13, %p2424_p12 }
  0x1f   :  { %p2427_p1 = pnand %p2426_p0, %p2420_p11 }
  0x21   :  { %2430 = shalt.err (!%p2427_p1)
}
  0x22   :  { %41 = dma.hbm_to_vmem [thread:$0]  %s2980_s2, 1536, %s36_s16, [#allocation9], %s2460_s11, %s2460_s11, %s2461_s12  }
  0x23   :  { %2453 = dma.done.wait [#allocation6], 1536  }
  0x24   :  { %2454 = vsyncadd [#allocation6], 4294965760 }
  0x25   :  { %2455 = dma.done.wait [#allocation9], 1536  }
  0x26   :  { %2456 = vsyncadd [#allocation9], 4294965760  ;;  %v2463_v0 = vmov 0.0   ;;  %vm2464_vm0 = vmmov 0   ;;  %v2275_v1 = vld [vmem:[#allocation5] sm:$0xff]   ;;  %v2277_v3 = vld [vmem:[#allocation5 + $0x8] sm:$0xff]  }
  0x27   :  { %1944 = vmatprep.subr.bf16.mxu0 %v2463_v0  ;;  %1956 = vmatprep.subr.bf16.mxu1 %v2463_v0  ;;  %v2276_v2 = vld [vmem:[#allocation5 + $0x20] sm:$0xff]   ;;  %v2278_v4 = vld [vmem:[#allocation5 + $0x28] sm:$0xff]   ;;  %v2279_v5 = vld [vmem:[#allocation5 + $0x10] sm:$0xff]   ;;  %vm101_vm1 = vcmask 523264   ;;  %vm1065_vm2 = vcmask 1041408   ;;  %vm1067_vm3 = vcmask 1043456  }
  0x28   :  { %1952 = vmatprep.mubr.msk.bf16.mxu0 %vm2464_vm0, %v2463_v0  ;;  %1964 = vmatprep.mubr.msk.bf16.mxu1 %vm2464_vm0, %v2463_v0  ;;  %v2280_v6 = vld [vmem:[#allocation5 + $0x30] sm:$0xff]   ;;  %v2281_v7 = vld [vmem:[#allocation5 + $0x18] sm:$0xff]   ;;  %v2284_v10 = vld [vmem:[#allocation5 + $0x40] sm:$0xff]   ;;  %vm1069_vm4 = vcmask 1045504   ;;  %s2465_s16 = smov [#allocation10]   ;;  %vm1708_vm5 = vcmask 523270  }
  0x29   :  { %1945 = vmatpush3.bf16.msra.mxu0 %v2275_v1  ;;  %1957 = vmatpush3.bf16.msra.mxu1 %v2276_v2  ;;  %v2282_v8 = vld [vmem:[#allocation5 + $0x38] sm:$0xff]   ;;  %v2283_v9 = vld [vmem:[%s2978_s0] sm:$0xff]   ;;  %v2546_v11 = vld [vmem:[#allocation8] sm:$0xff]   ;;  %s1718_s17 = sshll.u32 %s2465_s16, 4  ;;  %s1719_s17 = int_to_ptr.vmem [resolvable:$true] %s1718_s17 }
  0x2a   :  { %1946 = vmatprep.subr.bf16.mxu0 %v2463_v0  ;;  %1958 = vmatprep.subr.bf16.mxu1 %v2463_v0  ;;  %v2286_v12 = vld [vmem:[#allocation5 + $0x48] sm:$0xff]   ;;  %v2288_v14 = vld [vmem:[#allocation5 + $0x50] sm:$0xff]   ;;  %v2290_v16 = vld [vmem:[#allocation5 + $0x58] sm:$0xff]   ;;  %s2431_s20 = scalar_lea.vmem %s1719_s17, 32  ;;  %p2436_p3 = scmp.lt.s32.totalorder %s1719_s17, %s1719_s17 }
  0x2b   :  { %v2553_v13 = vld [vmem:[#allocation8 + $0x8] sm:$0xff]   ;;  %v2562_v15 = vld [vmem:[#allocation8 + $0x10] sm:$0xff]   ;;  %v2567_v17 = vld [vmem:[#allocation8 + $0x18] sm:$0xff]   ;;  %p2432_p2 = scmp.ne.s32.totalorder %s1719_s17, %s2431_s20  ;;  %p2437_p4 = scmp.lt.s32.totalorder %s2431_s20, %s2431_s20 }
  0x2c   :  { %v2572_v18 = vld [vmem:[%s2983_s5] sm:$0x3]  ;;  %v2577_v20 = vld [vmem:[#allocation8 + $0x20] sm:$0xff]   ;;  %v2587_v22 = vld [vmem:[#allocation8 + $0x28] sm:$0xff]  }
  0x2d   :  { %1947 = vmatpush3.bf16.msra.mxu0 %v2277_v3  ;;  %1959 = vmatpush3.bf16.msra.mxu1 %v2278_v4  ;;  %v373_v19 = vpack.c.bf16 %v2572_v18, %v2572_v18  ;;  %v2581_v21 = vld [vmem:[#allocation8 + $0x40] sm:$0xff]   ;;  %v2591_v23 = vld [vmem:[#allocation8 + $0x48] sm:$0xff]   ;;  %v2599_v24 = vld [vmem:[#allocation8 + $0x30] sm:$0xff]   ;;  %p2438_p5 = por %p2437_p4, %p2436_p3 }
  0x2e   :  { %1948 = vmatprep.subr.bf16.mxu0 %v2463_v0  ;;  %1960 = vmatprep.subr.bf16.mxu1 %v2463_v0  ;;  %v2603_v25 = vld [vmem:[#allocation8 + $0x50] sm:$0xff]   ;;  %v2607_v26 = vld [vmem:[#allocation8 + $0x38] sm:$0xff]  }
  0x2f   :  { %v2611_v27 = vld [vmem:[#allocation8 + $0x58] sm:$0xff]   ;;  %v1730_v28 = vld [vmem:[%s2981_s3] ss:$0 sm:$0xff]  ;;  %v1739_v29 = vld [vmem:[%s2981_s3 + $0x1] ss:$0 sm:$0xff]  ;;  %p2439_p6 = pnand %p2438_p5, %p2432_p2 }
  0x30   :  { %v1737_v31 = vld [vmem:[%s2982_s4] ss:$0 sm:$0xff]  ;;  %v1746_v35 = vld [vmem:[%s2982_s4 + $0x1] ss:$0 sm:$0xff]  ;;  %v1748_v48 = vld [vmem:[%s2981_s3 + $0x2] ss:$0 sm:$0xff] }
  0x31   :  { %1949 = vmatpush3.bf16.msra.mxu0 %v2279_v5  ;;  %1961 = vmatpush3.bf16.msra.mxu1 %v2280_v6 }
  0x32   :  { %1950 = vmatprep.subr.bf16.mxu0 %v2463_v0  ;;  %1962 = vmatprep.subr.bf16.mxu1 %v2463_v0 }
  0x35   :  { %1951 = vmatpush3.bf16.msra.mxu0 %v2281_v7  ;;  %1963 = vmatpush3.bf16.msra.mxu1 %v2282_v8 }
  0x36   :  { %1968 = vmatprep.subr.bf16.mxu0 %v2463_v0  ;;  %1980 = vmatprep.subr.bf16.mxu1 %v2463_v0 }
  0x38   :  { %1953 = vmatmul.mubr.msk.bf16.vlgmr.msra.gmra.mrb[0].mxu0 %vm101_vm1, %v2283_v9  ;;  %1965 = vmatmul.mubr.msk.bf16.vlgmr.msra.gmra.mrb[0].mxu1 %vm101_vm1, %v2283_v9 }
  0x39   :  { %1969 = vmatpush3.bf16.msra.mxu0 %v2284_v10  ;;  %1981 = vmatpush3.bf16.msra.mxu1 %v2546_v11 }
  0x3a   :  { %1970 = vmatprep.subr.bf16.mxu0 %v2463_v0  ;;  %1982 = vmatprep.subr.bf16.mxu1 %v2463_v0 }
  0x3b   :  { %1976 = vmatprep.mubr.msk.bf16.mxu0 %vm2464_vm0, %v2463_v0  ;;  %1988 = vmatprep.mubr.msk.bf16.mxu1 %vm2464_vm0, %v2463_v0 }
  0x3d   :  { %1971 = vmatpush3.bf16.msra.mxu0 %v2286_v12  ;;  %1983 = vmatpush3.bf16.msra.mxu1 %v2553_v13 }
  0x3e   :  { %1972 = vmatprep.subr.bf16.mxu0 %v2463_v0  ;;  %1984 = vmatprep.subr.bf16.mxu1 %v2463_v0 }
  0x41   :  { %1973 = vmatpush3.bf16.msra.mxu0 %v2288_v14  ;;  %1985 = vmatpush3.bf16.msra.mxu1 %v2562_v15  ;;  %v2670_v14 = vld [vmem:[%s2982_s4 + $0x2] ss:$0 sm:$0xff] }
  0x42   :  { %1974 = vmatprep.subr.bf16.mxu0 %v2463_v0  ;;  %1986 = vmatprep.subr.bf16.mxu1 %v2463_v0 }
  0x45   :  { %1975 = vmatpush3.bf16.msra.mxu0 %v2290_v16  ;;  %1987 = vmatpush3.bf16.msra.mxu1 %v2567_v17 }
  0x46   :  { %1992 = vmatprep.subr.bf16.mxu0 %v2463_v0  ;;  %2004 = vmatprep.subr.bf16.mxu1 %v2463_v0 }
  0x48   :  { %1977 = vmatmul.mubr.msk.bf16.vlgmr.msra.gmra.mrb[4].mxu0 %vm101_vm1, %v2283_v9  ;;  %1989 = vmatmul.mubr.msk.bf16.vlgmr.msra.gmra.mrb[4].mxu1 %vm101_vm1, %v373_v19 }
  0x49   :  { %1993 = vmatpush3.bf16.msra.mxu0 %v2577_v20  ;;  %2005 = vmatpush3.bf16.msra.mxu1 %v2581_v21 }
  0x4a   :  { %1994 = vmatprep.subr.bf16.mxu0 %v2463_v0  ;;  %2006 = vmatprep.subr.bf16.mxu1 %v2463_v0 }
  0x4b   :  { %2000 = vmatprep.mubr.msk.bf16.mxu0 %vm2464_vm0, %v2463_v0  ;;  %2012 = vmatprep.mubr.msk.bf16.mxu1 %vm2464_vm0, %v2463_v0 }
  0x4d   :  { %1995 = vmatpush3.bf16.msra.mxu0 %v2587_v22  ;;  %2007 = vmatpush3.bf16.msra.mxu1 %v2591_v23 }
  0x4e   :  { %1996 = vmatprep.subr.bf16.mxu0 %v2463_v0  ;;  %2008 = vmatprep.subr.bf16.mxu1 %v2463_v0 }
  0x51   :  { %1997 = vmatpush3.bf16.msra.mxu0 %v2599_v24  ;;  %2009 = vmatpush3.bf16.msra.mxu1 %v2603_v25 }
  0x52   :  { %1998 = vmatprep.subr.bf16.mxu0 %v2463_v0  ;;  %2010 = vmatprep.subr.bf16.mxu1 %v2463_v0 }
  0x55   :  { %1999 = vmatpush3.bf16.msra.mxu0 %v2607_v26  ;;  %2011 = vmatpush3.bf16.msra.mxu1 %v2611_v27 }
  0x56   :  { %2016 = vmatprep.subr.bf16.mxu0 %v2463_v0  ;;  %2028 = vmatprep.subr.bf16.mxu1 %v2463_v0 }
  0x58   :  { %2001 = vmatmul.mubr.msk.bf16.vlgmr.msra.gmra.mrb[8].mxu0 %vm101_vm1, %v373_v19  ;;  %2013 = vmatmul.mubr.msk.bf16.vlgmr.msra.gmra.mrb[8].mxu1 %vm101_vm1, %v373_v19 }
  0x59   :  { %2017 = vmatpush3.bf16.msra.mxu0 %v2546_v11  ;;  %2029 = vmatpush3.bf16.msra.mxu1 %v2577_v20 }
  0x5a   :  { %2018 = vmatprep.subr.bf16.mxu0 %v2463_v0  ;;  %2030 = vmatprep.subr.bf16.mxu1 %v2463_v0 }
  0x5b   :  { %2024 = vmatprep.mubr.msk.bf16.mxu0 %vm2464_vm0, %v2463_v0  ;;  %2036 = vmatprep.mubr.msk.bf16.mxu1 %vm2464_vm0, %v2463_v0 }
  0x5d   :  { %2019 = vmatpush3.bf16.msra.mxu0 %v2553_v13  ;;  %2031 = vmatpush3.bf16.msra.mxu1 %v2587_v22 }
  0x5e   :  { %2020 = vmatprep.subr.bf16.mxu0 %v2463_v0  ;;  %2032 = vmatprep.subr.bf16.mxu1 %v2463_v0 }
  0x61   :  { %2021 = vmatpush3.bf16.msra.mxu0 %v2562_v15  ;;  %2033 = vmatpush3.bf16.msra.mxu1 %v2599_v24 }
  0x62   :  { %2022 = vmatprep.subr.bf16.mxu0 %v2463_v0  ;;  %2034 = vmatprep.subr.bf16.mxu1 %v2463_v0 }
  0x65   :  { %2023 = vmatpush3.bf16.msra.mxu0 %v2567_v17  ;;  %2035 = vmatpush3.bf16.msra.mxu1 %v2607_v26 }
  0x66   :  { %2040 = vmatprep.subr.bf16.mxu0 %v2463_v0  ;;  %2052 = vmatprep.subr.bf16.mxu1 %v2463_v0 }
 0x10b   :  { %v139_v30 = vpop.f32.mrb[0].mxu0  ;;  %v232_v34 = vpop.f32.mrb[0].mxu1 }
 0x10c   :  { %v140_v32 = vadd.f32 %v1730_v28, %v139_v30  ;;  %v1954_v33 = vpop.f32.mrb[1].mxu0  ;;  %v233_v36 = vadd.f32 %v1739_v29, %v232_v34  ;;  %v1966_v38 = vpop.f32.mrb[1].mxu1 }
 0x10d   :  { %v142_v37 = vpop.f32.mrb[2].mxu0  ;;  %v235_v42 = vpop.f32.mrb[2].mxu1 }
 0x10e   :  { %v153_v39 = vadd.f32 %v1737_v31, %v140_v32  ;;  %v143_v40 = vadd.f32 %v1730_v28, %v142_v37  ;;  %v1955_v41 = vpop.f32.mrb[3].mxu0  ;;  %v247_v43 = vadd.f32 %v1746_v35, %v233_v36  ;;  %v236_v44 = vadd.f32 %v1739_v29, %v235_v42  ;;  %v1967_v45 = vpop.f32.mrb[3].mxu1 }
 0x110   :  { %155 = vst.msk [vmem:[#allocation2] sm:$0xff] %vm101_vm1, %v153_v39  ;;  %v154_v46 = vadd.f32 %v1737_v31, %v143_v40  ;;  %249 = vst.msk [vmem:[#allocation3] sm:$0xff] %vm101_vm1, %v247_v43  ;;  %v248_v47 = vadd.f32 %v1746_v35, %v236_v44 }
 0x112   :  { %156 = vst.msk [vmem:[#allocation2 + $0x8] sm:$0xff] %vm101_vm1, %v154_v46  ;;  %250 = vst.msk [vmem:[#allocation3 + $0x8] sm:$0xff] %vm101_vm1, %v248_v47 }
 0x117   :  { %v2659_v51 = vld [vmem:[#allocation2] sm:$0xff]  ;;  %v2664_v63 = vld [vmem:[#allocation3] sm:$0xff] }
 0x11b   :  { %v326_v49 = vpop.f32.mrb[4].mxu0  ;;  %v435_v52 = vpop.f32.mrb[4].mxu1 }
 0x11c   :  { %v327_v50 = vadd.f32 %v1748_v48, %v326_v49  ;;  %v1978_v53 = vpop.f32.mrb[5].mxu0  ;;  %v569_v54 = vadd.f32 %v435_v52, %v2659_v51  ;;  %v1990_v55 = vpop.f32.mrb[5].mxu1 }
 0x11d   :  { %v329_v56 = vpop.f32.mrb[6].mxu0  ;;  %v438_v58 = vpop.f32.mrb[6].mxu1 }
 0x11e   :  { %333 = vst.msk [vmem:[#allocation4] sm:$0xff] %vm101_vm1, %v327_v50  ;;  %v330_v57 = vadd.f32 %v1748_v48, %v329_v56  ;;  %v1979_v59 = vpop.f32.mrb[7].mxu0  ;;  %v1771_v60 = vmul.f32 -1.442695, %v569_v54  ;;  %v1991_v61 = vpop.f32.mrb[7].mxu1 }
 0x120   :  { %334 = vst.msk [vmem:[#allocation4 + $0x8] sm:$0xff] %vm101_vm1, %v330_v57  ;;  %2300 = vpow2.f32 %v1771_v60 }
 0x125   :  { %v2673_v30 = vld [vmem:[#allocation4] sm:$0xff] }
 0x12a   :  { %v2301_v62 = vpop.eup %2300 }
 0x12b   :  { %v499_v1 = vpop.f32.mrb[8].mxu0  ;;  %v573_v2 = vadd.f32 1.0, %v2301_v62  ;;  %v563_v5 = vpop.f32.mrb[8].mxu1 }
 0x12c   :  { %v576_v3 = vadd.f32 %v499_v1, %v2664_v63  ;;  %v2002_v4 = vpop.f32.mrb[9].mxu0  ;;  %v2014_v7 = vpop.f32.mrb[9].mxu1  ;;  %v564_v16 = vadd.f32 %v2670_v14, %v563_v5 }
 0x12d   :  { %v502_v6 = vpop.f32.mrb[10].mxu0  ;;  %2302 = vrcp.f32 %v573_v2  ;;  %v566_v10 = vpop.f32.mrb[10].mxu1 }
 0x12e   :  { %v1772_v8 = vmul.f32 -1.442695, %v576_v3  ;;  %v2003_v9 = vpop.f32.mrb[11].mxu0  ;;  %v2015_v12 = vpop.f32.mrb[11].mxu1 }
 0x130   :  { %2304 = vpow2.f32 %v1772_v8 }
 0x137   :  { %v2303_v19 = vpop.eup %2302 }
 0x138   :  { %v583_v28 = vmul.f32 %v2303_v19, %v564_v16 }
 0x13a   :  { %v2305_v29 = vpop.eup %2304  ;;  %v584_v32 = vadd.f32 %v583_v28, %v2673_v30 }
 0x13b   :  { %v580_v31 = vadd.f32 1.0, %v2305_v29 }
 0x13d   :  { %2306 = vrcp.f32 %v580_v31 }
 0x13e   :  { %2308 = vtanh.f32 %v584_v32 }
 0x147   :  { %v2307_v33 = vpop.eup %2306 }
 0x148   :  { %v586_v34 = vsub.f32 1.0, %v2307_v33  ;;  %v2309_v35 = vpop.eup %2308  ;;  %v588_v36 = vmul.f32 %v2307_v33, %v2572_v18 }
 0x14a   :  { %v587_v37 = vmul.f32 %v2309_v35, %v586_v34 }
 0x14c   :  { %v2677_v38 = vadd.f32 %v588_v36, %v587_v37 }
 0x14e   :  { %v590_v39 = vpack.c.bf16 %v2677_v38, %v2677_v38  ;;  %v743_v7 = vrot.slane %v2677_v38, 6 }
 0x150   :  { %2025 = vmatmul.mubr.msk.bf16.vlgmr.msra.gmra.mrb[12].mxu0 %vm101_vm1, %v590_v39  ;;  %2037 = vmatmul.mubr.msk.bf16.vlgmr.msra.gmra.mrb[12].mxu1 %vm101_vm1, %v590_v39 }
 0x151   :  { %2041 = vmatpush3.bf16.msra.mxu0 %v2581_v21  ;;  %2048 = vmatprep.mubr.msk.bf16.mxu0 %vm2464_vm0, %v2463_v0 }
 0x152   :  { %2042 = vmatprep.subr.bf16.mxu0 %v2463_v0  ;;  %2053 = vmatpush3.bf16.msra.mxu1 %v2546_v11 }
 0x153   :  { %2054 = vmatprep.subr.bf16.mxu1 %v2463_v0  ;;  %2060 = vmatprep.mubr.msk.bf16.mxu1 %vm2464_vm0, %v2463_v0 }
 0x155   :  { %2043 = vmatpush3.bf16.msra.mxu0 %v2591_v23 }
 0x156   :  { %2044 = vmatprep.subr.bf16.mxu0 %v2463_v0  ;;  %2055 = vmatpush3.bf16.msra.mxu1 %v2553_v13 }
 0x157   :  { %2056 = vmatprep.subr.bf16.mxu1 %v2463_v0 }
 0x159   :  { %2045 = vmatpush3.bf16.msra.mxu0 %v2603_v25 }
 0x15a   :  { %2046 = vmatprep.subr.bf16.mxu0 %v2463_v0  ;;  %2057 = vmatpush3.bf16.msra.mxu1 %v2562_v15 }
 0x15b   :  { %2058 = vmatprep.subr.bf16.mxu1 %v2463_v0 }
 0x15d   :  { %2047 = vmatpush3.bf16.msra.mxu0 %v2611_v27 }
 0x15e   :  { %2064 = vmatprep.subr.bf16.mxu0 %v2463_v0  ;;  %2059 = vmatpush3.bf16.msra.mxu1 %v2567_v17 }
 0x15f   :  { %2076 = vmatprep.subr.bf16.mxu1 %v2463_v0 }
 0x160   :  { %2049 = vmatmul.mubr.msk.bf16.vlgmr.msra.gmra.mrb[16].mxu0 %vm101_vm1, %v590_v39 }
 0x161   :  { %2065 = vmatpush3.bf16.msra.mxu0 %v2577_v20  ;;  %2072 = vmatprep.mubr.msk.bf16.mxu0 %vm2464_vm0, %v2463_v0 }
 0x162   :  { %2066 = vmatprep.subr.bf16.mxu0 %v2463_v0 }
 0x165   :  { %2067 = vmatpush3.bf16.msra.mxu0 %v2587_v22 }
 0x166   :  { %2068 = vmatprep.subr.bf16.mxu0 %v2463_v0 }
 0x169   :  { %2069 = vmatpush3.bf16.msra.mxu0 %v2599_v24 }
 0x16a   :  { %2070 = vmatprep.subr.bf16.mxu0 %v2463_v0 }
 0x16d   :  { %2071 = vmatpush3.bf16.msra.mxu0 %v2607_v26 }
 0x16e   :  { %2088 = vmatprep.subr.bf16.mxu0 %v2463_v0 }
 0x223   :  { %v628_v18 = vpop.f32.mrb[12].mxu0  ;;  %v668_v40 = vpop.f32.mrb[12].mxu1 }
 0x224   :  { %v715_v41 = vrot.slane %v628_v18, 6  ;;  %v2026_v42 = vpop.f32.mrb[13].mxu0  ;;  %v2038_v43 = vpop.f32.mrb[13].mxu1  ;;  %v725_v44 = vrot.slane %v668_v40, 6 }
 0x225   :  { %v631_v45 = vpop.f32.mrb[14].mxu0  ;;  %v671_v46 = vpop.f32.mrb[14].mxu1 }
 0x226   :  { %v717_v47 = vadd.f32 %v715_v41, %v2659_v51  ;;  %v2027_v48 = vpop.f32.mrb[15].mxu0  ;;  %v2039_v49 = vpop.f32.mrb[15].mxu1  ;;  %v727_v52 = vadd.f32 %v725_v44, %v2664_v63 }
 0x228   :  { %v1776_v50 = vmul.f32 -1.442695, %v717_v47  ;;  %v1777_v53 = vmul.f32 -1.442695, %v727_v52 }
 0x22a   :  { %2310 = vpow2.f32 %v1776_v50 }
 0x22b   :  { %2312 = vpow2.f32 %v1777_v53 }
 0x233   :  { %v708_v54 = vpop.f32.mrb[16].mxu0 }
 0x234   :  { %v2311_v55 = vpop.eup %2310  ;;  %v2050_v56 = vpop.f32.mrb[17].mxu0  ;;  %v709_v61 = vadd.f32 %v2670_v14, %v708_v54 }
 0x235   :  { %v721_v57 = vadd.f32 1.0, %v2311_v55  ;;  %v711_v58 = vpop.f32.mrb[18].mxu0  ;;  %v2313_v60 = vpop.eup %2312 }
 0x236   :  { %v2051_v59 = vpop.f32.mrb[19].mxu0  ;;  %v731_v62 = vadd.f32 1.0, %v2313_v60  ;;  %v735_v1 = vrot.slane %v709_v61, 6 }
 0x237   :  { %2314 = vrcp.f32 %v721_v57 }
 0x238   :  { %2316 = vrcp.f32 %v731_v62 }
 0x241   :  { %v2315_v2 = vpop.eup %2314 }
 0x242   :  { %v737_v3 = vmul.f32 %v2315_v2, %v735_v1  ;;  %v2317_v5 = vpop.eup %2316 }
 0x243   :  { %v740_v6 = vsub.f32 1.0, %v2317_v5  ;;  %v745_v9 = vmul.f32 %v2317_v5, %v743_v7 }
 0x244   :  { %v738_v4 = vadd.f32 %v737_v3, %v2673_v30 }
 0x246   :  { %2318 = vtanh.f32 %v738_v4 }
 0x250   :  { %v2319_v8 = vpop.eup %2318 }
 0x251   :  { %v741_v10 = vmul.f32 %v2319_v8, %v740_v6 }
 0x253   :  { %v2719_v12 = vadd.f32 %v745_v9, %v741_v10 }
 0x255   :  { %v747_v16 = vpack.c.bf16 %v2719_v12, %v2719_v12  ;;  %v902_v55 = vrot.slane %v2719_v12, 6  ;;  %v1066_v2 = vsel %vm1065_vm2, %v2677_v38, %v2719_v12 }
 0x257   :  { %v749_v19 = vrot.slane %v747_v16, 1 }
 0x259   :  { %2061 = vmatmul.mubr.msk.bf16.vlgmr.msra.gmra.mrb[16].mxu1 %vm101_vm1, %v749_v19  ;;  %2073 = vmatmul.mubr.msk.bf16.vlgmr.msra.gmra.mrb[20].mxu0 %vm101_vm1, %v749_v19 }
 0x25a   :  { %2077 = vmatpush3.bf16.msra.mxu1 %v2581_v21  ;;  %2084 = vmatprep.mubr.msk.bf16.mxu1 %vm2464_vm0, %v2463_v0 }
 0x25b   :  { %2078 = vmatprep.subr.bf16.mxu1 %v2463_v0  ;;  %2089 = vmatpush3.bf16.msra.mxu0 %v2546_v11 }
 0x25c   :  { %2090 = vmatprep.subr.bf16.mxu0 %v2463_v0  ;;  %2096 = vmatprep.mubr.msk.bf16.mxu0 %vm2464_vm0, %v2463_v0 }
 0x25e   :  { %2079 = vmatpush3.bf16.msra.mxu1 %v2591_v23 }
 0x25f   :  { %2080 = vmatprep.subr.bf16.mxu1 %v2463_v0  ;;  %2091 = vmatpush3.bf16.msra.mxu0 %v2553_v13 }
 0x260   :  { %2092 = vmatprep.subr.bf16.mxu0 %v2463_v0 }
 0x262   :  { %2081 = vmatpush3.bf16.msra.mxu1 %v2603_v25 }
 0x263   :  { %2082 = vmatprep.subr.bf16.mxu1 %v2463_v0  ;;  %2093 = vmatpush3.bf16.msra.mxu0 %v2562_v15 }
 0x264   :  { %2094 = vmatprep.subr.bf16.mxu0 %v2463_v0 }
 0x266   :  { %2083 = vmatpush3.bf16.msra.mxu1 %v2611_v27 }
 0x267   :  { %2100 = vmatprep.subr.bf16.mxu1 %v2463_v0  ;;  %2095 = vmatpush3.bf16.msra.mxu0 %v2567_v17 }
 0x268   :  { %2112 = vmatprep.subr.bf16.mxu0 %v2463_v0 }
 0x269   :  { %2085 = vmatmul.mubr.msk.bf16.vlgmr.msra.gmra.mrb[20].mxu1 %vm101_vm1, %v749_v19 }
 0x26a   :  { %2101 = vmatpush3.bf16.msra.mxu1 %v2577_v20  ;;  %2108 = vmatprep.mubr.msk.bf16.mxu1 %vm2464_vm0, %v2463_v0 }
 0x26b   :  { %2102 = vmatprep.subr.bf16.mxu1 %v2463_v0 }
 0x26e   :  { %2103 = vmatpush3.bf16.msra.mxu1 %v2587_v22 }
 0x26f   :  { %2104 = vmatprep.subr.bf16.mxu1 %v2463_v0 }
 0x272   :  { %2105 = vmatpush3.bf16.msra.mxu1 %v2599_v24 }
 0x273   :  { %2106 = vmatprep.subr.bf16.mxu1 %v2463_v0 }
 0x276   :  { %2107 = vmatpush3.bf16.msra.mxu1 %v2607_v26 }
 0x277   :  { %2124 = vmatprep.subr.bf16.mxu1 %v2463_v0 }
 0x32c   :  { %v787_v28 = vpop.f32.mrb[16].mxu1  ;;  %v827_v29 = vpop.f32.mrb[20].mxu0 }
 0x32d   :  { %v874_v31 = vrot.slane %v787_v28, 4  ;;  %v884_v32 = vrot.slane %v827_v29, 4  ;;  %v2062_v33 = vpop.f32.mrb[17].mxu1  ;;  %v2074_v34 = vpop.f32.mrb[21].mxu0 }
 0x32e   :  { %v790_v35 = vpop.f32.mrb[18].mxu1  ;;  %v830_v36 = vpop.f32.mrb[22].mxu0 }
 0x32f   :  { %v876_v37 = vadd.f32 %v874_v31, %v2659_v51  ;;  %v886_v39 = vadd.f32 %v884_v32, %v2664_v63  ;;  %v2063_v18 = vpop.f32.mrb[19].mxu1  ;;  %v2075_v40 = vpop.f32.mrb[23].mxu0 }
 0x331   :  { %v1781_v41 = vmul.f32 -1.442695, %v876_v37  ;;  %v1782_v42 = vmul.f32 -1.442695, %v886_v39 }
 0x333   :  { %2320 = vpow2.f32 %v1781_v41 }
 0x334   :  { %2322 = vpow2.f32 %v1782_v42 }
 0x33c   :  { %v867_v43 = vpop.f32.mrb[20].mxu1 }
 0x33d   :  { %v2321_v44 = vpop.eup %2320  ;;  %v2086_v45 = vpop.f32.mrb[21].mxu1  ;;  %v868_v52 = vadd.f32 %v2670_v14, %v867_v43 }
 0x33e   :  { %v2323_v46 = vpop.eup %2322  ;;  %v880_v47 = vadd.f32 1.0, %v2321_v44  ;;  %v870_v48 = vpop.f32.mrb[22].mxu1 }
 0x33f   :  { %v890_v49 = vadd.f32 1.0, %v2323_v46  ;;  %v2087_v50 = vpop.f32.mrb[23].mxu1  ;;  %v894_v53 = vrot.slane %v868_v52, 4 }
 0x340   :  { %2324 = vrcp.f32 %v880_v47 }
 0x341   :  { %2326 = vrcp.f32 %v890_v49 }
 0x34a   :  { %v2325_v54 = vpop.eup %2324 }
 0x34b   :  { %v2327_v56 = vpop.eup %2326  ;;  %v896_v57 = vmul.f32 %v2325_v54, %v894_v53 }
 0x34c   :  { %v904_v58 = vmul.f32 %v2327_v56, %v902_v55  ;;  %v899_v60 = vsub.f32 1.0, %v2327_v56  ;;  %v2854_v55 = vld [vmem:[#allocation2 + $0x8] sm:$0xff] }
 0x34d   :  { %v897_v59 = vadd.f32 %v896_v57, %v2673_v30  ;;  %v2856_v57 = vld [vmem:[#allocation3 + $0x8] sm:$0xff] }
 0x34f   :  { %2328 = vtanh.f32 %v897_v59 }
 0x359   :  { %v2329_v61 = vpop.eup %2328 }
 0x35a   :  { %v900_v62 = vmul.f32 %v2329_v61, %v899_v60 }
 0x35c   :  { %v2761_v1 = vadd.f32 %v904_v58, %v900_v62 }
 0x35e   :  { %v906_v3 = vpack.c.bf16 %v2761_v1, %v2761_v1  ;;  %v2770_v4 = vsel %vm1067_vm3, %v1066_v2, %v2761_v1  ;;  %v1061_v43 = vrot.slane %v2761_v1, 6 }
 0x360   :  { %v908_v5 = vrot.slane %v906_v3, 2 }
 0x362   :  { %2097 = vmatmul.mubr.msk.bf16.vlgmr.msra.gmra.mrb[24].mxu0 %vm101_vm1, %v908_v5  ;;  %2109 = vmatmul.mubr.msk.bf16.vlgmr.msra.gmra.mrb[24].mxu1 %vm101_vm1, %v908_v5 }
 0x363   :  { %2113 = vmatpush3.bf16.msra.mxu0 %v2581_v21  ;;  %2120 = vmatprep.mubr.msk.bf16.mxu0 %vm2464_vm0, %v2463_v0 }
 0x364   :  { %2114 = vmatprep.subr.bf16.mxu0 %v2463_v0  ;;  %2125 = vmatpush3.bf16.msra.mxu1 %v2546_v11 }
 0x365   :  { %2126 = vmatprep.subr.bf16.mxu1 %v2463_v0  ;;  %2132 = vmatprep.mubr.msk.bf16.mxu1 %vm2464_vm0, %v2463_v0 }
 0x367   :  { %2115 = vmatpush3.bf16.msra.mxu0 %v2591_v23 }
 0x368   :  { %2116 = vmatprep.subr.bf16.mxu0 %v2463_v0  ;;  %2127 = vmatpush3.bf16.msra.mxu1 %v2553_v13 }
 0x369   :  { %2128 = vmatprep.subr.bf16.mxu1 %v2463_v0 }
 0x36b   :  { %2117 = vmatpush3.bf16.msra.mxu0 %v2603_v25 }
 0x36c   :  { %2118 = vmatprep.subr.bf16.mxu0 %v2463_v0  ;;  %2129 = vmatpush3.bf16.msra.mxu1 %v2562_v15 }
 0x36d   :  { %2130 = vmatprep.subr.bf16.mxu1 %v2463_v0 }
 0x36f   :  { %2119 = vmatpush3.bf16.msra.mxu0 %v2611_v27 }
 0x370   :  { %2136 = vmatprep.subr.bf16.mxu0 %v2463_v0  ;;  %2131 = vmatpush3.bf16.msra.mxu1 %v2567_v17 }
 0x371   :  { %2148 = vmatprep.subr.bf16.mxu1 %v2463_v0 }
 0x372   :  { %2121 = vmatmul.mubr.msk.bf16.vlgmr.msra.gmra.mrb[28].mxu0 %vm101_vm1, %v908_v5 }
 0x373   :  { %2137 = vmatpush3.bf16.msra.mxu0 %v2577_v20  ;;  %2144 = vmatprep.mubr.msk.bf16.mxu0 %vm2464_vm0, %v2463_v0 }
 0x374   :  { %2138 = vmatprep.subr.bf16.mxu0 %v2463_v0 }
 0x377   :  { %2139 = vmatpush3.bf16.msra.mxu0 %v2587_v22 }
 0x378   :  { %2140 = vmatprep.subr.bf16.mxu0 %v2463_v0 }
 0x37b   :  { %2141 = vmatpush3.bf16.msra.mxu0 %v2599_v24 }
 0x37c   :  { %2142 = vmatprep.subr.bf16.mxu0 %v2463_v0 }
 0x37f   :  { %2143 = vmatpush3.bf16.msra.mxu0 %v2607_v26 }
 0x380   :  { %2160 = vmatprep.subr.bf16.mxu0 %v2463_v0 }
 0x435   :  { %v946_v38 = vpop.f32.mrb[24].mxu0  ;;  %v986_v6 = vpop.f32.mrb[24].mxu1 }
 0x436   :  { %v1033_v7 = vrot.slane %v946_v38, 2  ;;  %v1043_v8 = vrot.slane %v986_v6, 2  ;;  %v2098_v9 = vpop.f32.mrb[25].mxu0  ;;  %v2110_v10 = vpop.f32.mrb[25].mxu1 }
 0x437   :  { %v949_v12 = vpop.f32.mrb[26].mxu0  ;;  %v989_v16 = vpop.f32.mrb[26].mxu1 }
 0x438   :  { %v1035_v19 = vadd.f32 %v1033_v7, %v2659_v51  ;;  %v1045_v28 = vadd.f32 %v1043_v8, %v2664_v63  ;;  %v2099_v29 = vpop.f32.mrb[27].mxu0  ;;  %v2111_v31 = vpop.f32.mrb[27].mxu1 }
 0x43a   :  { %v1786_v32 = vmul.f32 -1.442695, %v1035_v19  ;;  %v1787_v33 = vmul.f32 -1.442695, %v1045_v28 }
 0x43c   :  { %2330 = vpow2.f32 %v1786_v32 }
 0x43d   :  { %2332 = vpow2.f32 %v1787_v33 }
 0x445   :  { %v1026_v34 = vpop.f32.mrb[28].mxu0 }
 0x446   :  { %v2331_v35 = vpop.eup %2330  ;;  %v2122_v36 = vpop.f32.mrb[29].mxu0  ;;  %v1027_v51 = vadd.f32 %v2670_v14, %v1026_v34 }
 0x447   :  { %v2333_v37 = vpop.eup %2332  ;;  %v1039_v39 = vadd.f32 1.0, %v2331_v35  ;;  %v1029_v18 = vpop.f32.mrb[30].mxu0  ;;  %v2862_v35 = vld [vmem:[#allocation4 + $0x8] sm:$0xff] }
 0x448   :  { %v1049_v40 = vadd.f32 1.0, %v2333_v37  ;;  %v2123_v41 = vpop.f32.mrb[31].mxu0  ;;  %v1053_v42 = vrot.slane %v1027_v51, 2 }
 0x449   :  { %2334 = vrcp.f32 %v1039_v39 }
 0x44a   :  { %2336 = vrcp.f32 %v1049_v40 }
 0x453   :  { %v2335_v63 = vpop.eup %2334 }
 0x454   :  { %v2337_v44 = vpop.eup %2336  ;;  %v1055_v45 = vmul.f32 %v2335_v63, %v1053_v42 }
 0x455   :  { %v1063_v46 = vmul.f32 %v2337_v44, %v1061_v43  ;;  %v1058_v48 = vsub.f32 1.0, %v2337_v44 }
 0x456   :  { %v1056_v47 = vadd.f32 %v1055_v45, %v2673_v30 }
 0x458   :  { %2338 = vtanh.f32 %v1056_v47 }
 0x462   :  { %v2339_v49 = vpop.eup %2338 }
 0x463   :  { %v1059_v50 = vmul.f32 %v2339_v49, %v1058_v48 }
 0x465   :  { %v2810_v52 = vadd.f32 %v1063_v46, %v1059_v50 }
 0x467   :  { %v1078_v53 = vpack.c.bf16 %v2810_v52, %v2810_v52  ;;  %v1070_v54 = vsel %vm1069_vm4, %v2770_v4, %v2810_v52  ;;  %v1224_v31 = vrot.slane %v2810_v52, 6 }
 0x468   :  { %1071 = vst.msk [vmem:[%s2984_s6] sm:$0xff] %vm101_vm1, %v1070_v54 }
 0x469   :  { %v1080_v30 = vrot.slane %v1078_v53, 3 }
 0x46b   :  { %2133 = vmatmul.mubr.msk.bf16.vlgmr.msra.gmra.mrb[28].mxu1 %vm101_vm1, %v1080_v30  ;;  %2145 = vmatmul.mubr.msk.bf16.vlgmr.msra.gmra.mrb[32].mxu0 %vm101_vm1, %v1080_v30 }
 0x46c   :  { %2149 = vmatpush3.bf16.msra.mxu1 %v2581_v21  ;;  %2156 = vmatprep.mubr.msk.bf16.mxu1 %vm2464_vm0, %v2463_v0 }
 0x46d   :  { %2150 = vmatprep.subr.bf16.mxu1 %v2463_v0  ;;  %2161 = vmatpush3.bf16.msra.mxu0 %v2546_v11 }
 0x46e   :  { %2162 = vmatprep.subr.bf16.mxu0 %v2463_v0  ;;  %2168 = vmatprep.mubr.msk.bf16.mxu0 %vm2464_vm0, %v2463_v0 }
 0x470   :  { %2151 = vmatpush3.bf16.msra.mxu1 %v2591_v23 }
 0x471   :  { %2152 = vmatprep.subr.bf16.mxu1 %v2463_v0  ;;  %2163 = vmatpush3.bf16.msra.mxu0 %v2553_v13 }
 0x472   :  { %2164 = vmatprep.subr.bf16.mxu0 %v2463_v0 }
 0x474   :  { %2153 = vmatpush3.bf16.msra.mxu1 %v2603_v25 }
 0x475   :  { %2154 = vmatprep.subr.bf16.mxu1 %v2463_v0  ;;  %2165 = vmatpush3.bf16.msra.mxu0 %v2562_v15 }
 0x476   :  { %2166 = vmatprep.subr.bf16.mxu0 %v2463_v0 }
 0x478   :  { %2155 = vmatpush3.bf16.msra.mxu1 %v2611_v27 }
 0x479   :  { %2172 = vmatprep.subr.bf16.mxu1 %v2463_v0  ;;  %2167 = vmatpush3.bf16.msra.mxu0 %v2567_v17 }
 0x47a   :  { %2184 = vmatprep.subr.bf16.mxu0 %v2463_v0 }
 0x47b   :  { %2157 = vmatmul.mubr.msk.bf16.vlgmr.msra.gmra.mrb[32].mxu1 %vm101_vm1, %v1080_v30 }
 0x47c   :  { %2173 = vmatpush3.bf16.msra.mxu1 %v2577_v20  ;;  %2180 = vmatprep.mubr.msk.bf16.mxu1 %vm2464_vm0, %v2463_v0 }
 0x47d   :  { %2174 = vmatprep.subr.bf16.mxu1 %v2463_v0 }
 0x480   :  { %2175 = vmatpush3.bf16.msra.mxu1 %v2587_v22 }
 0x481   :  { %2176 = vmatprep.subr.bf16.mxu1 %v2463_v0 }
 0x484   :  { %2177 = vmatpush3.bf16.msra.mxu1 %v2599_v24 }
 0x485   :  { %2178 = vmatprep.subr.bf16.mxu1 %v2463_v0 }
 0x488   :  { %2179 = vmatpush3.bf16.msra.mxu1 %v2607_v26 }
 0x489   :  { %2196 = vmatprep.subr.bf16.mxu1 %v2463_v0 }
 0x53e   :  { %v1118_v56 = vpop.f32.mrb[28].mxu1  ;;  %v1158_v58 = vpop.f32.mrb[32].mxu0 }
 0x53f   :  { %v1204_v59 = vadd.f32 %v1118_v56, %v2854_v55  ;;  %v1211_v60 = vadd.f32 %v1158_v58, %v2856_v57  ;;  %v2134_v61 = vpop.f32.mrb[29].mxu1  ;;  %v2146_v62 = vpop.f32.mrb[33].mxu0 }
 0x540   :  { %v1121_v1 = vpop.f32.mrb[30].mxu1  ;;  %v1161_v2 = vpop.f32.mrb[34].mxu0 }
 0x541   :  { %v1791_v3 = vmul.f32 -1.442695, %v1204_v59  ;;  %v1792_v4 = vmul.f32 -1.442695, %v1211_v60  ;;  %v2135_v5 = vpop.f32.mrb[31].mxu1  ;;  %v2147_v38 = vpop.f32.mrb[35].mxu0 }
 0x543   :  { %2340 = vpow2.f32 %v1791_v3 }
 0x544   :  { %2342 = vpow2.f32 %v1792_v4 }
 0x54d   :  { %v2341_v6 = vpop.eup %2340 }
 0x54e   :  { %v2343_v7 = vpop.eup %2342  ;;  %v1208_v8 = vadd.f32 1.0, %v2341_v6  ;;  %v1198_v9 = vpop.f32.mrb[32].mxu1 }
 0x54f   :  { %v1215_v10 = vadd.f32 1.0, %v2343_v7  ;;  %v2158_v12 = vpop.f32.mrb[33].mxu1  ;;  %v1199_v28 = vadd.f32 %v2670_v14, %v1198_v9 }
 0x550   :  { %2344 = vrcp.f32 %v1208_v8  ;;  %v1201_v16 = vpop.f32.mrb[34].mxu1 }
 0x551   :  { %2346 = vrcp.f32 %v1215_v10  ;;  %v2159_v19 = vpop.f32.mrb[35].mxu1  ;;  %v2380_v16 = vld [vmem:[#allocation8] sm:$0xff]  }
 0x552   :  { %v2381_v19 = vld [vmem:[#allocation8 + $0x8] sm:$0xff]  }
 0x55a   :  { %v2345_v29 = vpop.eup %2344 }
 0x55b   :  { %v2347_v32 = vpop.eup %2346  ;;  %v1218_v33 = vmul.f32 %v2345_v29, %v1199_v28 }
 0x55c   :  { %v1226_v34 = vmul.f32 %v2347_v32, %v1224_v31  ;;  %v1221_v37 = vsub.f32 1.0, %v2347_v32 }
 0x55d   :  { %v1219_v36 = vadd.f32 %v1218_v33, %v2862_v35 }
 0x55f   :  { %2348 = vtanh.f32 %v1219_v36 }
 0x569   :  { %v2349_v39 = vpop.eup %2348 }
 0x56a   :  { %v1222_v18 = vmul.f32 %v2349_v39, %v1221_v37 }
 0x56c   :  { %v2865_v40 = vadd.f32 %v1226_v34, %v1222_v18 }
 0x56e   :  { %v1228_v41 = vpack.c.bf16 %v2865_v40, %v2865_v40  ;;  %v1381_v38 = vrot.slane %v2865_v40, 6 }
 0x570   :  { %2169 = vmatmul.mubr.msk.bf16.vlgmr.msra.gmra.mrb[36].mxu0 %vm101_vm1, %v1228_v41  ;;  %2181 = vmatmul.mubr.msk.bf16.vlgmr.msra.gmra.mrb[36].mxu1 %vm101_vm1, %v1228_v41 }
 0x571   :  { %2185 = vmatpush3.bf16.msra.mxu0 %v2581_v21  ;;  %2192 = vmatprep.mubr.msk.bf16.mxu0 %vm2464_vm0, %v2463_v0 }
 0x572   :  { %2186 = vmatprep.subr.bf16.mxu0 %v2463_v0  ;;  %2197 = vmatpush3.bf16.msra.mxu1 %v2546_v11 }
 0x573   :  { %2198 = vmatprep.subr.bf16.mxu1 %v2463_v0  ;;  %2204 = vmatprep.mubr.msk.bf16.mxu1 %vm2464_vm0, %v2463_v0 }
 0x575   :  { %2187 = vmatpush3.bf16.msra.mxu0 %v2591_v23 }
 0x576   :  { %2188 = vmatprep.subr.bf16.mxu0 %v2463_v0  ;;  %2199 = vmatpush3.bf16.msra.mxu1 %v2553_v13 }
 0x577   :  { %2200 = vmatprep.subr.bf16.mxu1 %v2463_v0 }
 0x579   :  { %2189 = vmatpush3.bf16.msra.mxu0 %v2603_v25 }
 0x57a   :  { %2190 = vmatprep.subr.bf16.mxu0 %v2463_v0  ;;  %2201 = vmatpush3.bf16.msra.mxu1 %v2562_v15 }
 0x57b   :  { %2202 = vmatprep.subr.bf16.mxu1 %v2463_v0 }
 0x57d   :  { %2191 = vmatpush3.bf16.msra.mxu0 %v2611_v27 }
 0x57e   :  { %2208 = vmatprep.subr.bf16.mxu0 %v2463_v0  ;;  %2203 = vmatpush3.bf16.msra.mxu1 %v2567_v17 }
 0x57f   :  { %2220 = vmatprep.subr.bf16.mxu1 %v2463_v0 }
 0x580   :  { %2193 = vmatmul.mubr.msk.bf16.vlgmr.msra.gmra.mrb[40].mxu0 %vm101_vm1, %v1228_v41 }
 0x581   :  { %2209 = vmatpush3.bf16.msra.mxu0 %v2577_v20  ;;  %2216 = vmatprep.mubr.msk.bf16.mxu0 %vm2464_vm0, %v2463_v0 }
 0x582   :  { %2210 = vmatprep.subr.bf16.mxu0 %v2463_v0 }
 0x585   :  { %2211 = vmatpush3.bf16.msra.mxu0 %v2587_v22 }
 0x586   :  { %2212 = vmatprep.subr.bf16.mxu0 %v2463_v0 }
 0x589   :  { %2213 = vmatpush3.bf16.msra.mxu0 %v2599_v24 }
 0x58a   :  { %2214 = vmatprep.subr.bf16.mxu0 %v2463_v0 }
 0x58d   :  { %2215 = vmatpush3.bf16.msra.mxu0 %v2607_v26 }
 0x58e   :  { %2232 = vmatprep.subr.bf16.mxu0 %v2463_v0 }
 0x643   :  { %v1266_v11 = vpop.f32.mrb[36].mxu0  ;;  %v1306_v13 = vpop.f32.mrb[36].mxu1 }
 0x644   :  { %v1353_v15 = vrot.slane %v1266_v11, 6  ;;  %v2170_v51 = vpop.f32.mrb[37].mxu0  ;;  %v2182_v42 = vpop.f32.mrb[37].mxu1  ;;  %v1363_v63 = vrot.slane %v1306_v13, 6 }
 0x645   :  { %v1269_v43 = vpop.f32.mrb[38].mxu0  ;;  %v1309_v44 = vpop.f32.mrb[38].mxu1 }
 0x646   :  { %v1355_v45 = vadd.f32 %v1353_v15, %v2854_v55  ;;  %v2171_v46 = vpop.f32.mrb[39].mxu0  ;;  %v2183_v47 = vpop.f32.mrb[39].mxu1  ;;  %v1365_v49 = vadd.f32 %v1363_v63, %v2856_v57 }
 0x648   :  { %v1796_v48 = vmul.f32 -1.442695, %v1355_v45  ;;  %v1797_v50 = vmul.f32 -1.442695, %v1365_v49 }
 0x64a   :  { %2350 = vpow2.f32 %v1796_v48 }
 0x64b   :  { %2352 = vpow2.f32 %v1797_v50 }
 0x653   :  { %v1346_v52 = vpop.f32.mrb[40].mxu0 }
 0x654   :  { %v2351_v53 = vpop.eup %2350  ;;  %v2194_v54 = vpop.f32.mrb[41].mxu0  ;;  %v1347_v60 = vadd.f32 %v2670_v14, %v1346_v52 }
 0x655   :  { %v1359_v30 = vadd.f32 1.0, %v2351_v53  ;;  %v1349_v56 = vpop.f32.mrb[42].mxu0  ;;  %v2353_v59 = vpop.eup %2352 }
 0x656   :  { %v2195_v58 = vpop.f32.mrb[43].mxu0  ;;  %v1369_v61 = vadd.f32 1.0, %v2353_v59  ;;  %v1373_v62 = vrot.slane %v1347_v60, 6  ;;  %v2384_v59 = vld [vmem:[#allocation8 + $0x48] sm:$0xff]   ;;  %v2386_v60 = vld [vmem:[#allocation8 + $0x58] sm:$0xff]  }
 0x657   :  { %2354 = vrcp.f32 %v1359_v30  ;;  %v2383_v58 = vld [vmem:[#allocation8 + $0x40] sm:$0xff]  }
 0x658   :  { %2356 = vrcp.f32 %v1369_v61 }
 0x661   :  { %v2355_v1 = vpop.eup %2354 }
 0x662   :  { %v1375_v2 = vmul.f32 %v2355_v1, %v1373_v62  ;;  %v2357_v4 = vpop.eup %2356 }
 0x663   :  { %v1378_v5 = vsub.f32 1.0, %v2357_v4  ;;  %v1383_v7 = vmul.f32 %v2357_v4, %v1381_v38 }
 0x664   :  { %v1376_v3 = vadd.f32 %v1375_v2, %v2862_v35 }
 0x666   :  { %2358 = vtanh.f32 %v1376_v3 }
 0x670   :  { %v2359_v6 = vpop.eup %2358 }
 0x671   :  { %v1379_v8 = vmul.f32 %v2359_v6, %v1378_v5 }
 0x673   :  { %v2907_v9 = vadd.f32 %v1383_v7, %v1379_v8 }
 0x675   :  { %v1385_v10 = vpack.c.bf16 %v2907_v9, %v2907_v9  ;;  %v1540_v43 = vrot.slane %v2907_v9, 6  ;;  %v1703_v53 = vsel %vm1065_vm2, %v2865_v40, %v2907_v9  ;;  %v2385_v40 = vld [vmem:[#allocation8 + $0x50] sm:$0xff]  }
 0x677   :  { %v1387_v12 = vrot.slane %v1385_v10, 1 }
 0x679   :  { %2205 = vmatmul.mubr.msk.bf16.vlgmr.msra.gmra.mrb[40].mxu1 %vm101_vm1, %v1387_v12  ;;  %2217 = vmatmul.mubr.msk.bf16.vlgmr.msra.gmra.mrb[44].mxu0 %vm101_vm1, %v1387_v12 }
 0x67a   :  { %2221 = vmatpush3.bf16.msra.mxu1 %v2581_v21  ;;  %2228 = vmatprep.mubr.msk.bf16.mxu1 %vm2464_vm0, %v2463_v0  ;;  %v2382_v21 = vld [vmem:[#allocation8 + $0x10] sm:$0xff]  }
 0x67b   :  { %2222 = vmatprep.subr.bf16.mxu1 %v2463_v0  ;;  %2233 = vmatpush3.bf16.msra.mxu0 %v2380_v16 }
 0x67c   :  { %2234 = vmatprep.subr.bf16.mxu0 %v2463_v0  ;;  %2240 = vmatprep.mubr.msk.bf16.mxu0 %vm2464_vm0, %v2463_v0 }
 0x67e   :  { %2223 = vmatpush3.bf16.msra.mxu1 %v2591_v23 }
 0x67f   :  { %2224 = vmatprep.subr.bf16.mxu1 %v2463_v0  ;;  %2235 = vmatpush3.bf16.msra.mxu0 %v2381_v19 }
 0x680   :  { %2236 = vmatprep.subr.bf16.mxu0 %v2463_v0 }
 0x682   :  { %2225 = vmatpush3.bf16.msra.mxu1 %v2603_v25 }
 0x683   :  { %2226 = vmatprep.subr.bf16.mxu1 %v2463_v0  ;;  %2237 = vmatpush3.bf16.msra.mxu0 %v2382_v21 }
 0x684   :  { %2238 = vmatprep.subr.bf16.mxu0 %v2463_v0 }
 0x686   :  { %2227 = vmatpush3.bf16.msra.mxu1 %v2611_v27 }
 0x687   :  { %2244 = vmatprep.subr.bf16.mxu1 %v2463_v0  ;;  %2239 = vmatpush3.bf16.msra.mxu0 %v2567_v17 }
 0x688   :  { %2256 = vmatprep.subr.bf16.mxu0 %v2463_v0 }
 0x689   :  { %2229 = vmatmul.mubr.msk.bf16.vlgmr.msra.gmra.mrb[44].mxu1 %vm101_vm1, %v1387_v12 }
 0x68a   :  { %2245 = vmatpush3.bf16.msra.mxu1 %v2577_v20  ;;  %2252 = vmatprep.mubr.msk.bf16.mxu1 %vm2464_vm0, %v2463_v0 }
 0x68b   :  { %2246 = vmatprep.subr.bf16.mxu1 %v2463_v0 }
 0x68e   :  { %2247 = vmatpush3.bf16.msra.mxu1 %v2587_v22 }
 0x68f   :  { %2248 = vmatprep.subr.bf16.mxu1 %v2463_v0 }
 0x692   :  { %2249 = vmatpush3.bf16.msra.mxu1 %v2599_v24 }
 0x693   :  { %2250 = vmatprep.subr.bf16.mxu1 %v2463_v0 }
 0x696   :  { %2251 = vmatpush3.bf16.msra.mxu1 %v2607_v26 }
 0x74c   :  { %v1425_v17 = vpop.f32.mrb[40].mxu1  ;;  %v1465_v23 = vpop.f32.mrb[44].mxu0 }
 0x74d   :  { %v1512_v25 = vrot.slane %v1425_v17, 4  ;;  %v1522_v27 = vrot.slane %v1465_v23, 4  ;;  %v2206_v20 = vpop.f32.mrb[41].mxu1  ;;  %v2218_v28 = vpop.f32.mrb[45].mxu0 }
 0x74e   :  { %v1428_v29 = vpop.f32.mrb[42].mxu1  ;;  %v1468_v31 = vpop.f32.mrb[46].mxu0 }
 0x74f   :  { %v1514_v32 = vadd.f32 %v1512_v25, %v2854_v55  ;;  %v1524_v22 = vadd.f32 %v1522_v27, %v2856_v57  ;;  %v2207_v33 = vpop.f32.mrb[43].mxu1  ;;  %v2219_v34 = vpop.f32.mrb[47].mxu0 }
 0x751   :  { %v1801_v36 = vmul.f32 -1.442695, %v1514_v32  ;;  %v1802_v24 = vmul.f32 -1.442695, %v1524_v22 }
 0x753   :  { %2360 = vpow2.f32 %v1801_v36 }
 0x754   :  { %2362 = vpow2.f32 %v1802_v24 }
 0x75c   :  { %v1505_v37 = vpop.f32.mrb[44].mxu1 }
 0x75d   :  { %v2361_v26 = vpop.eup %2360  ;;  %v2230_v39 = vpop.f32.mrb[45].mxu1  ;;  %v1506_v51 = vadd.f32 %v2670_v14, %v1505_v37 }
 0x75e   :  { %v2363_v18 = vpop.eup %2362  ;;  %v1518_v41 = vadd.f32 1.0, %v2361_v26  ;;  %v1508_v11 = vpop.f32.mrb[46].mxu1 }
 0x75f   :  { %v1528_v13 = vadd.f32 1.0, %v2363_v18  ;;  %v2231_v15 = vpop.f32.mrb[47].mxu1  ;;  %v1532_v42 = vrot.slane %v1506_v51, 4 }
 0x760   :  { %2364 = vrcp.f32 %v1518_v41 }
 0x761   :  { %2366 = vrcp.f32 %v1528_v13 }
 0x76a   :  { %v2365_v63 = vpop.eup %2364 }
 0x76b   :  { %v2367_v44 = vpop.eup %2366  ;;  %v1534_v45 = vmul.f32 %v2365_v63, %v1532_v42 }
 0x76c   :  { %v1542_v46 = vmul.f32 %v2367_v44, %v1540_v43  ;;  %v1537_v48 = vsub.f32 1.0, %v2367_v44 }
 0x76d   :  { %v1535_v47 = vadd.f32 %v1534_v45, %v2862_v35 }
 0x76f   :  { %2368 = vtanh.f32 %v1535_v47 }
 0x779   :  { %v2369_v49 = vpop.eup %2368 }
 0x77a   :  { %v1538_v50 = vmul.f32 %v2369_v49, %v1537_v48 }
 0x77c   :  { %v1543_v52 = vadd.f32 %v1542_v46, %v1538_v50 }
 0x77e   :  { %v1544_v54 = vpack.c.bf16 %v1543_v52, %v1543_v52  ;;  %v1704_v30 = vsel %vm1067_vm3, %v1703_v53, %v1543_v52  ;;  %v1699_v28 = vrot.slane %v1543_v52, 6 }
 0x780   :  { %v1546_v56 = vrot.slane %v1544_v54, 2 }
 0x782   :  { %2241 = vmatmul.mubr.msk.bf16.vlgmr.msra.gmra.mrb[48].mxu0 %vm101_vm1, %v1546_v56  ;;  %2253 = vmatmul.mubr.msk.bf16.vlgmr.msra.gmra.mrb[48].mxu1 %vm101_vm1, %v1546_v56 }
 0x783   :  { %2257 = vmatpush3.bf16.msra.mxu0 %v2383_v58  ;;  %2264 = vmatprep.mubr.msk.bf16.mxu0 %vm2464_vm0, %v2463_v0 }
 0x784   :  { %2258 = vmatprep.subr.bf16.mxu0 %v2463_v0 }
 0x787   :  { %2259 = vmatpush3.bf16.msra.mxu0 %v2384_v59 }
 0x788   :  { %2260 = vmatprep.subr.bf16.mxu0 %v2463_v0 }
 0x78b   :  { %2261 = vmatpush3.bf16.msra.mxu0 %v2385_v40 }
 0x78c   :  { %2262 = vmatprep.subr.bf16.mxu0 %v2463_v0 }
 0x78f   :  { %2263 = vmatpush3.bf16.msra.mxu0 %v2386_v60 }
 0x792   :  { %2265 = vmatmul.mubr.msk.bf16.vlgmr.msra.gmra.mrb[52].mxu0 %vm101_vm1, %v1546_v56 }
 0x855   :  { %v1584_v61 = vpop.f32.mrb[48].mxu0  ;;  %v1624_v62 = vpop.f32.mrb[48].mxu1 }
 0x856   :  { %v1671_v1 = vrot.slane %v1584_v61, 2  ;;  %v1681_v2 = vrot.slane %v1624_v62, 2  ;;  %v2242_v3 = vpop.f32.mrb[49].mxu0  ;;  %v2254_v4 = vpop.f32.mrb[49].mxu1 }
 0x857   :  { %v1587_v5 = vpop.f32.mrb[50].mxu0  ;;  %v1627_v38 = vpop.f32.mrb[50].mxu1 }
 0x858   :  { %v1673_v6 = vadd.f32 %v1671_v1, %v2854_v55  ;;  %v1683_v7 = vadd.f32 %v1681_v2, %v2856_v57  ;;  %v2243_v8 = vpop.f32.mrb[51].mxu0  ;;  %v2255_v9 = vpop.f32.mrb[51].mxu1 }
 0x85a   :  { %v1806_v10 = vmul.f32 -1.442695, %v1673_v6  ;;  %v1807_v0 = vmul.f32 -1.442695, %v1683_v7 }
 0x85c   :  { %2370 = vpow2.f32 %v1806_v10 }
 0x85d   :  { %2372 = vpow2.f32 %v1807_v0 }
 0x865   :  { %v1664_v12 = vpop.f32.mrb[52].mxu0 }
 0x866   :  { %v2371_v16 = vpop.eup %2370  ;;  %v2266_v19 = vpop.f32.mrb[53].mxu0  ;;  %v1665_v55 = vadd.f32 %v2670_v14, %v1664_v12 }
 0x867   :  { %v2373_v21 = vpop.eup %2372  ;;  %v1677_v17 = vadd.f32 1.0, %v2371_v16  ;;  %v1667_v23 = vpop.f32.mrb[54].mxu0 }
 0x868   :  { %v1687_v25 = vadd.f32 1.0, %v2373_v21  ;;  %v2267_v27 = vpop.f32.mrb[55].mxu0  ;;  %v1691_v20 = vrot.slane %v1665_v55, 2 }
 0x869   :  { %2374 = vrcp.f32 %v1677_v17 }
 0x86a   :  { %2376 = vrcp.f32 %v1687_v25 }
 0x873   :  { %v2375_v57 = vpop.eup %2374 }
 0x874   :  { %v2377_v29 = vpop.eup %2376  ;;  %v1693_v31 = vmul.f32 %v2375_v57, %v1691_v20 }
 0x875   :  { %v1701_v32 = vmul.f32 %v2377_v29, %v1699_v28  ;;  %v1696_v33 = vsub.f32 1.0, %v2377_v29 }
 0x876   :  { %v1694_v22 = vadd.f32 %v1693_v31, %v2862_v35 }
 0x878   :  { %2378 = vtanh.f32 %v1694_v22 }
 0x882   :  { %v2379_v34 = vpop.eup %2378 }
 0x883   :  { %v1697_v36 = vmul.f32 %v2379_v34, %v1696_v33 }
 0x885   :  { %v1702_v24 = vadd.f32 %v1701_v32, %v1697_v36 }
 0x887   :  { %v1705_v37 = vsel %vm1069_vm4, %v1704_v30, %v1702_v24  ;;  %1709 = vst.msk [vmem:[#allocation10 - $0x6] sm:$0xc0] %vm1708_vm5, %v1702_v24 }
 0x888   :  { %1808 = vst.msk [vmem:[%s2984_s6 + $0x8] sm:$0xff] %vm101_vm1, %v1705_v37 }
 0x889   :  { %2442 = shalt.err (!%p2439_p6)
}
 0x88a   :  { %s2443_s23 = scalar_lea.hbm %s2985_s7, 32 }
 0x88b   :  { %p2444_p7 = scmp.ne.s32.totalorder %s2985_s7, %s2443_s23  ;;  %p2447_p8 = scmp.lt.u32.totalorder %s2443_s23, %s2985_s7 }
 0x88d   :  { %p2449_p9 = pnand %p2447_p8, %p2444_p7 }
 0x88f   :  { %2452 = shalt.err (!%p2449_p9)
}
 0x890   :  { %1721 = dma.vmem_to_hbm [thread:$0]  %s1719_s17, 32, %s2985_s7, [#allocation7]  }
 0x891   :  { %2457 = dma.done.wait [#allocation7], 32  }
 0x892   :  { %2458 = vsyncadd [#allocation7], 4294967264 }
 0x893   :  { %1727 = vsyncpa [#allocation6], 1 }
 0x894   :  { %1728 = vsyncpa [#allocation9], 1 }
 0x895   :  { %1729 = vsyncpa [#allocation7], 1 }

</bundles_post_ra>
